<compile_context>
chip_gen: v6e
topology: v6e:2x2x1
jax: 0.10.0
libtpu: 0.0.40
codegen_flags: <defaults>
</compile_context>

<pallas_src>
import functools

import jax
import jax.numpy as jnp
import numpy as np
from jax.experimental import pallas as pl
from jax.experimental.pallas import tpu as pltpu

EPS = 1e-5  # PyTorch BatchNorm1d default eps


def _bn_relu(h, tp, b):
    # BatchNorm1d (training mode, default affine == identity) where channel ==
    # sequence position.  h is (tp*b, F) with rows grouped position-major;
    # stats are biased mean/var over the (b, F) elements of EACH position.
    f = h.shape[1]
    h3 = h.reshape(tp, b, f)                     # layout-free when b % 8 == 0
    inv = 1.0 / float(b * f)
    mean = jnp.sum(jnp.sum(h3, axis=2, keepdims=True), axis=1, keepdims=True) * inv
    c = h3 - mean
    var = jnp.sum(jnp.sum(c * c, axis=2, keepdims=True), axis=1, keepdims=True) * inv
    y = jnp.maximum(c * jax.lax.rsqrt(var + EPS), 0.0)
    return y.reshape(tp * b, f)


def _linear(h, w_ref, b_ref):
    # MXU matmul: bf16 operands (weights pre-cast in the wrapper), f32 accumulate.
    return jnp.dot(h.astype(jnp.bfloat16), w_ref[...],
                   preferred_element_type=jnp.float32) + b_ref[...]


def gaze_embed_kernel(x_ref,
                      ew1, eb1, ew2, eb2, wm, bm, dw2, db2, dw3, db3,
                      out_ref, *, tp, b):
    # One grid step == `tp` sequence positions x full batch, flattened to rows.
    x = x_ref[...].astype(jnp.float32)           # (tp*b, Din)
    din = x.shape[1]

    # encoder fc1: tiny fan-in -> VPU broadcast FMAs (normalize folded into ew1)
    h = eb1[...]                                 # (1, 64)
    for k in range(din):                         # Din is tiny, static unroll
        h = h + x[:, k:k + 1] * ew1[k:k + 1, :]  # -> (tp*b, 64)

    h = _bn_relu(h, tp, b)                       # encoder bn1 + relu
    h = _bn_relu(_linear(h, ew2, eb2), tp, b)    # fc2 + bn2 + relu       (., 256)
    d = _bn_relu(_linear(h, wm, bm), tp, b)      # fused fc3.lin1 + bn+relu (., 256)
    d = _bn_relu(_linear(d, dw2, db2), tp, b)    # lin2 + bn + relu       (., 64)
    d = _linear(d, dw3, db3)                     # lin3 (+denorm), lane-dense (., 128)

    out_ref[...] = d.astype(out_ref.dtype)


def init_params(key, input_dim, latent_dim):
    # PyTorch-style Linear init U(-1/sqrt(fan_in), 1/sqrt(fan_in)); weights are
    # stored pre-transposed to (fan_in, fan_out), biases as (1, fan_out).
    dims = [
        (input_dim, 64), (64, 256), (256, latent_dim),      # encoder fc1/fc2/fc3
        (latent_dim, 256), (256, 64), (64, input_dim),      # decoder lin1/lin2/lin3
    ]
    params = []
    for fan_in, fan_out in dims:
        key, kw, kb = jax.random.split(key, 3)
        bound = 1.0 / float(np.sqrt(fan_in))
        params.append(jax.random.uniform(kw, (fan_in, fan_out), jnp.float32, -bound, bound))
        params.append(jax.random.uniform(kb, (1, fan_out), jnp.float32, -bound, bound))
    return params


def _screen_scale(din, invert):
    # Screen-pixel scaling for the first two coordinates (guarded for din < 2).
    vals = [1920.0, 1080.0]
    s = np.ones((din,), np.float32)
    for i in range(min(2, din)):
        s[i] = (1.0 / vals[i]) if invert else vals[i]
    return jnp.asarray(s)


def prepare_params(params, input_dim):
    """Fold normalize/denormalize into the edge layers, fuse encoder fc3 with
    decoder lin1 (no BN/ReLU between them), pad the output layer to a
    lane-dense width (multiple of 128), and cast MXU weights to bf16."""
    ew1, eb1, ew2, eb2, ew3, eb3, dw1, db1, dw2, db2, dw3, db3 = params
    out_pad = max(128, ((input_dim + 127) // 128) * 128)
    bf16 = jnp.bfloat16

    # normalize: x[..., 0] /= 1920, x[..., 1] /= 1080  ==  row-scaling of W1.
    ew1 = ew1 * _screen_scale(input_dim, invert=True)[:, None]   # stays f32 (VPU)

    # fc3 . lin1 fold:  (h@ew3 + eb3)@dw1 + db1  ==  h@(ew3@dw1) + (eb3@dw1 + db1)
    wm = ew3 @ dw1                                # (256, 256), composed in f32
    bm = eb3 @ dw1 + db1                          # (1, 256)

    # denormalize: column-scaling of W3/b3, then zero-pad to lane-dense width.
    dscale = _screen_scale(input_dim, invert=False)[None, :]
    pad = out_pad - input_dim
    dw3 = jnp.pad(dw3 * dscale, ((0, 0), (0, pad)))
    db3 = jnp.pad(db3 * dscale, ((0, 0), (0, pad)))

    return [ew1, eb1,
            ew2.astype(bf16), eb2,
            wm.astype(bf16), bm,
            dw2.astype(bf16), db2,
            dw3.astype(bf16), db3]


def _choose_tp(P, B, target_rows=512, sublane=16):
    """Positions per grid step: Tp divides P, Tp*B is aligned to the bf16
    sublane tile (16), Tp*B <= ~target_rows (full-height MXU passes while
    staying far below v7x's 64 MiB VMEM), and >= 2 grid steps when P allows
    (so v7x's two TensorCores both get work)."""
    start = min(P, max(1, target_rows // max(B, 1)))
    best = None
    for tp in range(start, 0, -1):
        if P % tp or (tp * B) % sublane:
            continue
        if best is None:
            best = tp
        if P // tp >= 2:
            return tp
    return best if best is not None else P      # fallback: single full block


def gaze_embed_forward(x, prepped, prediction_length, tp=None):
    # x: (B, S, input_dim) in the PyTorch convention.
    B, S, Din = x.shape
    P = prediction_length
    assert P <= S
    out_pad = prepped[-1].shape[-1]

    if tp is None:
        tp = _choose_tp(P, B)
    assert P % tp == 0
    grid = P // tp
    rows = tp * B

    # Only the first P positions ever reach the output (BN stats are per
    # position), so the kernel never touches positions >= P.  Flatten to
    # position-major rows so every kernel tile is a plain 2-D (rows, feat) slab.
    x_rows = jnp.transpose(x[:, :P, :], (1, 0, 2)).reshape(P * B, Din)

    param_specs = [pl.BlockSpec(p.shape, lambda i: (0, 0)) for p in prepped]
    kern = functools.partial(gaze_embed_kernel, tp=tp, b=B)

    out = pl.pallas_call(
        kern,
        out_shape=jax.ShapeDtypeStruct((P * B, out_pad), jnp.bfloat16),
        grid=(grid,),
        in_specs=[pl.BlockSpec((rows, Din), lambda i: (i, 0))] + param_specs,
        out_specs=pl.BlockSpec((rows, out_pad), lambda i: (i, 0)),
        compiler_params=pltpu.CompilerParams(
            dimension_semantics=("parallel",),
            vmem_limit_bytes=32 * 1024 * 1024),
    )(x_rows, *prepped)

    out = out.reshape(P, B, out_pad)[:, :, :Din].astype(jnp.float32)
    return jnp.transpose(out, (1, 0, 2))          # back to (B, P, Din)


def ref_forward(x, params, prediction_length):
    # Pure-JAX f32 reference mirroring the PyTorch module (training-mode BN).
    ew1, eb1, ew2, eb2, ew3, eb3, dw1, db1, dw2, db2, dw3, db3 = params
    din = x.shape[-1]
    nscale = _screen_scale(din, invert=True)
    dscale = _screen_scale(din, invert=False)

    def bn(h):  # h: (B, C, F) -> per-channel C stats over (B, F), biased var
        m = jnp.mean(h, axis=(0, 2), keepdims=True)
        v = jnp.mean((h - m) ** 2, axis=(0, 2), keepdims=True)
        return (h - m) / jnp.sqrt(v + EPS)

    h = x * nscale
    h = jnp.maximum(bn(h @ ew1 + eb1), 0.0)
    h = jnp.maximum(bn(h @ ew2 + eb2), 0.0)
    z = h @ ew3 + eb3
    zp = z[:, :prediction_length, :]
    d = jnp.maximum(bn(zp @ dw1 + db1), 0.0)
    d = jnp.maximum(bn(d @ dw2 + db2), 0.0)
    d = d @ dw3 + db3
    return d * dscale


if __name__ == "__main__":
    key = jax.random.PRNGKey(0)
    k_x, k_p = jax.random.split(key)

    batch, seq_len, pred_len = 8, 16, 8
    input_dim, latent_dim = 2, 32

    # Raw gaze coordinates in pixels (what the module sees before normalize()).
    x = jax.random.uniform(k_x, (batch, seq_len, input_dim), jnp.float32, 0.0, 1000.0)
    params = init_params(k_p, input_dim, latent_dim)
    prepped = prepare_params(params, input_dim)

    out = gaze_embed_forward(x, prepped, pred_len)
    out = jax.block_until_ready(out)

    ref = ref_forward(x, params, pred_len)

    # Compare in normalized (pre-denormalize) units: the kernel's MXU matmuls
    # and the padded output store run in bf16 (f32 accumulation), and the
    # 1920/1080 pixel scaling is an exact unit conversion applied identically
    # to both sides.
    scale = np.asarray(_screen_scale(input_dim, invert=False))
    np.testing.assert_allclose(np.asarray(out) / scale, np.asarray(ref) / scale,
                               rtol=5e-2, atol=5e-2)
    print("KERNEL_OK")
</pallas_src>

<mosaic_0001>
module attributes {stable_mosaic.version = 11 : i64} {
  func.func @gaze_embed_kernel(%arg0: i32, %arg1: memref<32x2xf32, #tpu.memory_space<vmem>>, %arg2: memref<2x64xf32, #tpu.memory_space<vmem>>, %arg3: memref<1x64xf32, #tpu.memory_space<vmem>>, %arg4: memref<64x256xbf16, #tpu.memory_space<vmem>>, %arg5: memref<1x256xf32, #tpu.memory_space<vmem>>, %arg6: memref<256x256xbf16, #tpu.memory_space<vmem>>, %arg7: memref<1x256xf32, #tpu.memory_space<vmem>>, %arg8: memref<256x64xbf16, #tpu.memory_space<vmem>>, %arg9: memref<1x64xf32, #tpu.memory_space<vmem>>, %arg10: memref<64x128xbf16, #tpu.memory_space<vmem>>, %arg11: memref<1x128xf32, #tpu.memory_space<vmem>>, %arg12: memref<32x128xbf16, #tpu.memory_space<vmem>>) attributes {dimension_semantics = [#tpu.dimension_semantics<parallel>], iteration_bounds = array<i64: 2>, scalar_prefetch = 0 : i64, scratch_operands = 0 : i64, tpu.core_type = #tpu.core_type<tc>, window_params = [{transform_indices = @transform_0, window_bounds = array<i64: 32, 2>}, {pipeline_mode = #tpu.pipeline_mode<synchronous>, transform_indices = @transform_1, window_bounds = array<i64: 2, 64>}, {pipeline_mode = #tpu.pipeline_mode<synchronous>, transform_indices = @transform_2, window_bounds = array<i64: 1, 64>}, {pipeline_mode = #tpu.pipeline_mode<synchronous>, transform_indices = @transform_3, window_bounds = array<i64: 64, 256>}, {pipeline_mode = #tpu.pipeline_mode<synchronous>, transform_indices = @transform_4, window_bounds = array<i64: 1, 256>}, {pipeline_mode = #tpu.pipeline_mode<synchronous>, transform_indices = @transform_5, window_bounds = array<i64: 256, 256>}, {pipeline_mode = #tpu.pipeline_mode<synchronous>, transform_indices = @transform_6, window_bounds = array<i64: 1, 256>}, {pipeline_mode = #tpu.pipeline_mode<synchronous>, transform_indices = @transform_7, window_bounds = array<i64: 256, 64>}, {pipeline_mode = #tpu.pipeline_mode<synchronous>, transform_indices = @transform_8, window_bounds = array<i64: 1, 64>}, {pipeline_mode = #tpu.pipeline_mode<synchronous>, transform_indices = @transform_9, window_bounds = array<i64: 64, 128>}, {pipeline_mode = #tpu.pipeline_mode<synchronous>, transform_indices = @transform_10, window_bounds = array<i64: 1, 128>}, {transform_indices = @transform_11, window_bounds = array<i64: 32, 128>}]} {
    %c0 = arith.constant 0 : index
    %c0_0 = arith.constant 0 : index
    %0 = vector.load %arg1[%c0, %c0_0] : memref<32x2xf32, #tpu.memory_space<vmem>>, vector<32x2xf32>
    %c0_1 = arith.constant 0 : index
    %c0_2 = arith.constant 0 : index
    %1 = vector.load %arg3[%c0_1, %c0_2] : memref<1x64xf32, #tpu.memory_space<vmem>>, vector<1x64xf32>
    %2 = vector.extract_strided_slice %0 {offsets = [0, 0], sizes = [32, 1], strides = [1, 1]} : vector<32x2xf32> to vector<32x1xf32>
    %c0_3 = arith.constant 0 : index
    %c0_4 = arith.constant 0 : index
    %3 = vector.load %arg2[%c0_3, %c0_4] : memref<2x64xf32, #tpu.memory_space<vmem>>, vector<1x64xf32>
    %4 = vector.broadcast %2 : vector<32x1xf32> to vector<32x64xf32>
    %5 = vector.broadcast %3 : vector<1x64xf32> to vector<32x64xf32>
    %6 = arith.mulf %4, %5 : vector<32x64xf32>
    %7 = vector.broadcast %1 : vector<1x64xf32> to vector<32x64xf32>
    %8 = arith.addf %7, %6 : vector<32x64xf32>
    %9 = vector.extract_strided_slice %0 {offsets = [0, 1], sizes = [32, 1], strides = [1, 1]} : vector<32x2xf32> to vector<32x1xf32>
    %c1 = arith.constant 1 : index
    %c0_5 = arith.constant 0 : index
    %10 = vector.load %arg2[%c1, %c0_5] : memref<2x64xf32, #tpu.memory_space<vmem>>, vector<1x64xf32>
    %11 = vector.broadcast %9 : vector<32x1xf32> to vector<32x64xf32>
    %12 = vector.broadcast %10 : vector<1x64xf32> to vector<32x64xf32>
    %13 = arith.mulf %11, %12 : vector<32x64xf32>
    %14 = arith.addf %8, %13 : vector<32x64xf32>
    %15 = vector.shape_cast %14 : vector<32x64xf32> to vector<4x8x64xf32>
    %cst = arith.constant dense<0.000000e+00> : vector<4x8xf32>
    %16 = vector.multi_reduction <add>, %15, %cst [2] : vector<4x8x64xf32> to vector<4x8xf32>
    %17 = vector.shape_cast %16 : vector<4x8xf32> to vector<4x8x1xf32>
    %cst_6 = arith.constant dense<0.000000e+00> : vector<4x1xf32>
    %18 = vector.multi_reduction <add>, %17, %cst_6 [1] : vector<4x8x1xf32> to vector<4x1xf32>
    %19 = vector.shape_cast %18 : vector<4x1xf32> to vector<4x1x1xf32>
    %cst_7 = arith.constant 0.001953125 : f32
    %20 = vector.broadcast %cst_7 : f32 to vector<4x1x1xf32>
    %21 = arith.mulf %19, %20 : vector<4x1x1xf32>
    %22 = vector.broadcast %21 : vector<4x1x1xf32> to vector<4x8x64xf32>
    %23 = arith.subf %15, %22 : vector<4x8x64xf32>
    %24 = arith.mulf %23, %23 : vector<4x8x64xf32>
    %cst_8 = arith.constant dense<0.000000e+00> : vector<4x8xf32>
    %25 = vector.multi_reduction <add>, %24, %cst_8 [2] : vector<4x8x64xf32> to vector<4x8xf32>
    %26 = vector.shape_cast %25 : vector<4x8xf32> to vector<4x8x1xf32>
    %cst_9 = arith.constant dense<0.000000e+00> : vector<4x1xf32>
    %27 = vector.multi_reduction <add>, %26, %cst_9 [1] : vector<4x8x1xf32> to vector<4x1xf32>
    %28 = vector.shape_cast %27 : vector<4x1xf32> to vector<4x1x1xf32>
    %cst_10 = arith.constant 0.001953125 : f32
    %29 = vector.broadcast %cst_10 : f32 to vector<4x1x1xf32>
    %30 = arith.mulf %28, %29 : vector<4x1x1xf32>
    %cst_11 = arith.constant 9.99999974E-6 : f32
    %31 = vector.broadcast %cst_11 : f32 to vector<4x1x1xf32>
    %32 = arith.addf %30, %31 : vector<4x1x1xf32>
    %33 = math.rsqrt %32 : vector<4x1x1xf32>
    %34 = vector.broadcast %33 : vector<4x1x1xf32> to vector<4x8x64xf32>
    %35 = arith.mulf %23, %34 : vector<4x8x64xf32>
    %cst_12 = arith.constant 0.000000e+00 : f32
    %36 = vector.broadcast %cst_12 : f32 to vector<4x8x64xf32>
    %37 = arith.maximumf %35, %36 : vector<4x8x64xf32>
    %38 = vector.shape_cast %37 : vector<4x8x64xf32> to vector<32x64xf32>
    %39 = arith.truncf %38 : vector<32x64xf32> to vector<32x64xbf16>
    %c0_13 = arith.constant 0 : index
    %c0_14 = arith.constant 0 : index
    %40 = vector.load %arg4[%c0_13, %c0_14] : memref<64x256xbf16, #tpu.memory_space<vmem>>, vector<64x256xbf16>
    %cst_15 = arith.constant dense<0.000000e+00> : vector<32x256xf32>
    %41 = tpu.matmul %39, %40, %cst_15 {dimension_numbers = #tpu.dot_dimension_numbers<[1], [0], [0], [1], [0, 0, 1, 1], [], []>} : vector<32x64xbf16>, vector<64x256xbf16>, vector<32x256xf32> -> vector<32x256xf32>
    %c0_16 = arith.constant 0 : index
    %c0_17 = arith.constant 0 : index
    %42 = vector.load %arg5[%c0_16, %c0_17] : memref<1x256xf32, #tpu.memory_space<vmem>>, vector<1x256xf32>
    %43 = vector.broadcast %42 : vector<1x256xf32> to vector<32x256xf32>
    %44 = arith.addf %41, %43 : vector<32x256xf32>
    %45 = vector.shape_cast %44 : vector<32x256xf32> to vector<4x8x256xf32>
    %cst_18 = arith.constant dense<0.000000e+00> : vector<4x8xf32>
    %46 = vector.multi_reduction <add>, %45, %cst_18 [2] : vector<4x8x256xf32> to vector<4x8xf32>
    %47 = vector.shape_cast %46 : vector<4x8xf32> to vector<4x8x1xf32>
    %cst_19 = arith.constant dense<0.000000e+00> : vector<4x1xf32>
    %48 = vector.multi_reduction <add>, %47, %cst_19 [1] : vector<4x8x1xf32> to vector<4x1xf32>
    %49 = vector.shape_cast %48 : vector<4x1xf32> to vector<4x1x1xf32>
    %cst_20 = arith.constant 4.8828125E-4 : f32
    %50 = vector.broadcast %cst_20 : f32 to vector<4x1x1xf32>
    %51 = arith.mulf %49, %50 : vector<4x1x1xf32>
    %52 = vector.broadcast %51 : vector<4x1x1xf32> to vector<4x8x256xf32>
    %53 = arith.subf %45, %52 : vector<4x8x256xf32>
    %54 = arith.mulf %53, %53 : vector<4x8x256xf32>
    %cst_21 = arith.constant dense<0.000000e+00> : vector<4x8xf32>
    %55 = vector.multi_reduction <add>, %54, %cst_21 [2] : vector<4x8x256xf32> to vector<4x8xf32>
    %56 = vector.shape_cast %55 : vector<4x8xf32> to vector<4x8x1xf32>
    %cst_22 = arith.constant dense<0.000000e+00> : vector<4x1xf32>
    %57 = vector.multi_reduction <add>, %56, %cst_22 [1] : vector<4x8x1xf32> to vector<4x1xf32>
    %58 = vector.shape_cast %57 : vector<4x1xf32> to vector<4x1x1xf32>
    %cst_23 = arith.constant 4.8828125E-4 : f32
    %59 = vector.broadcast %cst_23 : f32 to vector<4x1x1xf32>
    %60 = arith.mulf %58, %59 : vector<4x1x1xf32>
    %cst_24 = arith.constant 9.99999974E-6 : f32
    %61 = vector.broadcast %cst_24 : f32 to vector<4x1x1xf32>
    %62 = arith.addf %60, %61 : vector<4x1x1xf32>
    %63 = math.rsqrt %62 : vector<4x1x1xf32>
    %64 = vector.broadcast %63 : vector<4x1x1xf32> to vector<4x8x256xf32>
    %65 = arith.mulf %53, %64 : vector<4x8x256xf32>
    %cst_25 = arith.constant 0.000000e+00 : f32
    %66 = vector.broadcast %cst_25 : f32 to vector<4x8x256xf32>
    %67 = arith.maximumf %65, %66 : vector<4x8x256xf32>
    %68 = vector.shape_cast %67 : vector<4x8x256xf32> to vector<32x256xf32>
    %69 = arith.truncf %68 : vector<32x256xf32> to vector<32x256xbf16>
    %c0_26 = arith.constant 0 : index
    %c0_27 = arith.constant 0 : index
    %70 = vector.load %arg6[%c0_26, %c0_27] : memref<256x256xbf16, #tpu.memory_space<vmem>>, vector<256x256xbf16>
    %cst_28 = arith.constant dense<0.000000e+00> : vector<32x256xf32>
    %71 = tpu.matmul %69, %70, %cst_28 {dimension_numbers = #tpu.dot_dimension_numbers<[1], [0], [0], [1], [0, 0, 1, 1], [], []>} : vector<32x256xbf16>, vector<256x256xbf16>, vector<32x256xf32> -> vector<32x256xf32>
    %c0_29 = arith.constant 0 : index
    %c0_30 = arith.constant 0 : index
    %72 = vector.load %arg7[%c0_29, %c0_30] : memref<1x256xf32, #tpu.memory_space<vmem>>, vector<1x256xf32>
    %73 = vector.broadcast %72 : vector<1x256xf32> to vector<32x256xf32>
    %74 = arith.addf %71, %73 : vector<32x256xf32>
    %75 = vector.shape_cast %74 : vector<32x256xf32> to vector<4x8x256xf32>
    %cst_31 = arith.constant dense<0.000000e+00> : vector<4x8xf32>
    %76 = vector.multi_reduction <add>, %75, %cst_31 [2] : vector<4x8x256xf32> to vector<4x8xf32>
    %77 = vector.shape_cast %76 : vector<4x8xf32> to vector<4x8x1xf32>
    %cst_32 = arith.constant dense<0.000000e+00> : vector<4x1xf32>
    %78 = vector.multi_reduction <add>, %77, %cst_32 [1] : vector<4x8x1xf32> to vector<4x1xf32>
    %79 = vector.shape_cast %78 : vector<4x1xf32> to vector<4x1x1xf32>
    %cst_33 = arith.constant 4.8828125E-4 : f32
    %80 = vector.broadcast %cst_33 : f32 to vector<4x1x1xf32>
    %81 = arith.mulf %79, %80 : vector<4x1x1xf32>
    %82 = vector.broadcast %81 : vector<4x1x1xf32> to vector<4x8x256xf32>
    %83 = arith.subf %75, %82 : vector<4x8x256xf32>
    %84 = arith.mulf %83, %83 : vector<4x8x256xf32>
    %cst_34 = arith.constant dense<0.000000e+00> : vector<4x8xf32>
    %85 = vector.multi_reduction <add>, %84, %cst_34 [2] : vector<4x8x256xf32> to vector<4x8xf32>
    %86 = vector.shape_cast %85 : vector<4x8xf32> to vector<4x8x1xf32>
    %cst_35 = arith.constant dense<0.000000e+00> : vector<4x1xf32>
    %87 = vector.multi_reduction <add>, %86, %cst_35 [1] : vector<4x8x1xf32> to vector<4x1xf32>
    %88 = vector.shape_cast %87 : vector<4x1xf32> to vector<4x1x1xf32>
    %cst_36 = arith.constant 4.8828125E-4 : f32
    %89 = vector.broadcast %cst_36 : f32 to vector<4x1x1xf32>
    %90 = arith.mulf %88, %89 : vector<4x1x1xf32>
    %cst_37 = arith.constant 9.99999974E-6 : f32
    %91 = vector.broadcast %cst_37 : f32 to vector<4x1x1xf32>
    %92 = arith.addf %90, %91 : vector<4x1x1xf32>
    %93 = math.rsqrt %92 : vector<4x1x1xf32>
    %94 = vector.broadcast %93 : vector<4x1x1xf32> to vector<4x8x256xf32>
    %95 = arith.mulf %83, %94 : vector<4x8x256xf32>
    %cst_38 = arith.constant 0.000000e+00 : f32
    %96 = vector.broadcast %cst_38 : f32 to vector<4x8x256xf32>
    %97 = arith.maximumf %95, %96 : vector<4x8x256xf32>
    %98 = vector.shape_cast %97 : vector<4x8x256xf32> to vector<32x256xf32>
    %99 = arith.truncf %98 : vector<32x256xf32> to vector<32x256xbf16>
    %c0_39 = arith.constant 0 : index
    %c0_40 = arith.constant 0 : index
    %100 = vector.load %arg8[%c0_39, %c0_40] : memref<256x64xbf16, #tpu.memory_space<vmem>>, vector<256x64xbf16>
    %cst_41 = arith.constant dense<0.000000e+00> : vector<32x64xf32>
    %101 = tpu.matmul %99, %100, %cst_41 {dimension_numbers = #tpu.dot_dimension_numbers<[1], [0], [0], [1], [0, 0, 1, 1], [], []>} : vector<32x256xbf16>, vector<256x64xbf16>, vector<32x64xf32> -> vector<32x64xf32>
    %c0_42 = arith.constant 0 : index
    %c0_43 = arith.constant 0 : index
    %102 = vector.load %arg9[%c0_42, %c0_43] : memref<1x64xf32, #tpu.memory_space<vmem>>, vector<1x64xf32>
    %103 = vector.broadcast %102 : vector<1x64xf32> to vector<32x64xf32>
    %104 = arith.addf %101, %103 : vector<32x64xf32>
    %105 = vector.shape_cast %104 : vector<32x64xf32> to vector<4x8x64xf32>
    %cst_44 = arith.constant dense<0.000000e+00> : vector<4x8xf32>
    %106 = vector.multi_reduction <add>, %105, %cst_44 [2] : vector<4x8x64xf32> to vector<4x8xf32>
    %107 = vector.shape_cast %106 : vector<4x8xf32> to vector<4x8x1xf32>
    %cst_45 = arith.constant dense<0.000000e+00> : vector<4x1xf32>
    %108 = vector.multi_reduction <add>, %107, %cst_45 [1] : vector<4x8x1xf32> to vector<4x1xf32>
    %109 = vector.shape_cast %108 : vector<4x1xf32> to vector<4x1x1xf32>
    %cst_46 = arith.constant 0.001953125 : f32
    %110 = vector.broadcast %cst_46 : f32 to vector<4x1x1xf32>
    %111 = arith.mulf %109, %110 : vector<4x1x1xf32>
    %112 = vector.broadcast %111 : vector<4x1x1xf32> to vector<4x8x64xf32>
    %113 = arith.subf %105, %112 : vector<4x8x64xf32>
    %114 = arith.mulf %113, %113 : vector<4x8x64xf32>
    %cst_47 = arith.constant dense<0.000000e+00> : vector<4x8xf32>
    %115 = vector.multi_reduction <add>, %114, %cst_47 [2] : vector<4x8x64xf32> to vector<4x8xf32>
    %116 = vector.shape_cast %115 : vector<4x8xf32> to vector<4x8x1xf32>
    %cst_48 = arith.constant dense<0.000000e+00> : vector<4x1xf32>
    %117 = vector.multi_reduction <add>, %116, %cst_48 [1] : vector<4x8x1xf32> to vector<4x1xf32>
    %118 = vector.shape_cast %117 : vector<4x1xf32> to vector<4x1x1xf32>
    %cst_49 = arith.constant 0.001953125 : f32
    %119 = vector.broadcast %cst_49 : f32 to vector<4x1x1xf32>
    %120 = arith.mulf %118, %119 : vector<4x1x1xf32>
    %cst_50 = arith.constant 9.99999974E-6 : f32
    %121 = vector.broadcast %cst_50 : f32 to vector<4x1x1xf32>
    %122 = arith.addf %120, %121 : vector<4x1x1xf32>
    %123 = math.rsqrt %122 : vector<4x1x1xf32>
    %124 = vector.broadcast %123 : vector<4x1x1xf32> to vector<4x8x64xf32>
    %125 = arith.mulf %113, %124 : vector<4x8x64xf32>
    %cst_51 = arith.constant 0.000000e+00 : f32
    %126 = vector.broadcast %cst_51 : f32 to vector<4x8x64xf32>
    %127 = arith.maximumf %125, %126 : vector<4x8x64xf32>
    %128 = vector.shape_cast %127 : vector<4x8x64xf32> to vector<32x64xf32>
    %129 = arith.truncf %128 : vector<32x64xf32> to vector<32x64xbf16>
    %c0_52 = arith.constant 0 : index
    %c0_53 = arith.constant 0 : index
    %130 = vector.load %arg10[%c0_52, %c0_53] : memref<64x128xbf16, #tpu.memory_space<vmem>>, vector<64x128xbf16>
    %cst_54 = arith.constant dense<0.000000e+00> : vector<32x128xf32>
    %131 = tpu.matmul %129, %130, %cst_54 {dimension_numbers = #tpu.dot_dimension_numbers<[1], [0], [0], [1], [0, 0, 1, 1], [], []>} : vector<32x64xbf16>, vector<64x128xbf16>, vector<32x128xf32> -> vector<32x128xf32>
    %c0_55 = arith.constant 0 : index
    %c0_56 = arith.constant 0 : index
    %132 = vector.load %arg11[%c0_55, %c0_56] : memref<1x128xf32, #tpu.memory_space<vmem>>, vector<1x128xf32>
    %133 = vector.broadcast %132 : vector<1x128xf32> to vector<32x128xf32>
    %134 = arith.addf %131, %133 : vector<32x128xf32>
    %135 = arith.truncf %134 : vector<32x128xf32> to vector<32x128xbf16>
    %c0_57 = arith.constant 0 : index
    %c0_58 = arith.constant 0 : index
    %136 = vector.load %arg12[%c0_57, %c0_58] : memref<32x128xbf16, #tpu.memory_space<vmem>>, vector<32x128xbf16>
    tpu.vector_store %arg12[%c0_57, %c0_58], %135 {strides = array<i32>} : memref<32x128xbf16, #tpu.memory_space<vmem>>, vector<32x128xbf16>,
    return
  }
  func.func @transform_0(%arg0: i32) -> (i32, i32) {
    %c0_i32 = arith.constant 0 : i32
    %c0_i32_0 = arith.constant 0 : i32
    return %arg0, %c0_i32 : i32, i32
  }
  func.func @transform_1(%arg0: i32) -> (i32, i32) {
    %c0_i32 = arith.constant 0 : i32
    %c0_i32_0 = arith.constant 0 : i32
    %c0_i32_1 = arith.constant 0 : i32
    return %c0_i32, %c0_i32_0 : i32, i32
  }
  func.func @transform_2(%arg0: i32) -> (i32, i32) {
    %c0_i32 = arith.constant 0 : i32
    %c0_i32_0 = arith.constant 0 : i32
    %c0_i32_1 = arith.constant 0 : i32
    return %c0_i32, %c0_i32_0 : i32, i32
  }
  func.func @transform_3(%arg0: i32) -> (i32, i32) {
    %c0_i32 = arith.constant 0 : i32
    %c0_i32_0 = arith.constant 0 : i32
    %c0_i32_1 = arith.constant 0 : i32
    return %c0_i32, %c0_i32_0 : i32, i32
  }
  func.func @transform_4(%arg0: i32) -> (i32, i32) {
    %c0_i32 = arith.constant 0 : i32
    %c0_i32_0 = arith.constant 0 : i32
    %c0_i32_1 = arith.constant 0 : i32
    return %c0_i32, %c0_i32_0 : i32, i32
  }
  func.func @transform_5(%arg0: i32) -> (i32, i32) {
    %c0_i32 = arith.constant 0 : i32
    %c0_i32_0 = arith.constant 0 : i32
    %c0_i32_1 = arith.constant 0 : i32
    return %c0_i32, %c0_i32_0 : i32, i32
  }
  func.func @transform_6(%arg0: i32) -> (i32, i32) {
    %c0_i32 = arith.constant 0 : i32
    %c0_i32_0 = arith.constant 0 : i32
    %c0_i32_1 = arith.constant 0 : i32
    return %c0_i32, %c0_i32_0 : i32, i32
  }
  func.func @transform_7(%arg0: i32) -> (i32, i32) {
    %c0_i32 = arith.constant 0 : i32
    %c0_i32_0 = arith.constant 0 : i32
    %c0_i32_1 = arith.constant 0 : i32
    return %c0_i32, %c0_i32_0 : i32, i32
  }
  func.func @transform_8(%arg0: i32) -> (i32, i32) {
    %c0_i32 = arith.constant 0 : i32
    %c0_i32_0 = arith.constant 0 : i32
    %c0_i32_1 = arith.constant 0 : i32
    return %c0_i32, %c0_i32_0 : i32, i32
  }
  func.func @transform_9(%arg0: i32) -> (i32, i32) {
    %c0_i32 = arith.constant 0 : i32
    %c0_i32_0 = arith.constant 0 : i32
    %c0_i32_1 = arith.constant 0 : i32
    return %c0_i32, %c0_i32_0 : i32, i32
  }
  func.func @transform_10(%arg0: i32) -> (i32, i32) {
    %c0_i32 = arith.constant 0 : i32
    %c0_i32_0 = arith.constant 0 : i32
    %c0_i32_1 = arith.constant 0 : i32
    return %c0_i32, %c0_i32_0 : i32, i32
  }
  func.func @transform_11(%arg0: i32) -> (i32, i32) {
    %c0_i32 = arith.constant 0 : i32
    %c0_i32_0 = arith.constant 0 : i32
    return %arg0, %c0_i32 : i32, i32
  }
}

</mosaic_0001>

<bundles_post_ra>
// kernel: tpu_custom_call.1
= control target key start
LH: loop header
LB: loop body
LE: loop exit
PB: predicated region body
PF: predicated region fallthrough
CT: control target
= control target key end

     0   :  { %16 = vsyncpa [#allocation3], 0  ;;  %s2749_s0 = inlined_call_operand.vmem [shape: f32[64,2], index: 0, kind: input, shape index: {}]   ;;  %s2750_s1 = inlined_call_operand.vmem [shape: f32[2,64], index: 1, kind: input, shape index: {}]   ;;  %s2751_s2 = inlined_call_operand.vmem [shape: f32[1,64], index: 2, kind: input, shape index: {}]   ;;  %s2752_s3 = inlined_call_operand.hbm [shape: bf16[64,256], index: 3, kind: input, shape index: {}]   ;;  %s2753_s4 = inlined_call_operand.vmem [shape: f32[1,256], index: 4, kind: input, shape index: {}]   ;;  %s2754_s5 = inlined_call_operand.vmem [shape: bf16[256,256], index: 5, kind: input, shape index: {}]   ;;  %s2755_s6 = inlined_call_operand.vmem [shape: f32[1,256], index: 6, kind: input, shape index: {}]   ;;  %s2756_s7 = inlined_call_operand.vmem [shape: bf16[256,64], index: 7, kind: input, shape index: {}]   ;;  %s2757_s8 = inlined_call_operand.vmem [shape: f32[1,64], index: 8, kind: input, shape index: {}]   ;;  %s2758_s9 = inlined_call_operand.hbm [shape: bf16[64,128], index: 9, kind: input, shape index: {}]   ;;  %s2759_s10 = inlined_call_operand.vmem [shape: f32[1,128], index: 10, kind: input, shape index: {}]   ;;  %s2760_s11 = inlined_call_operand.hbm [shape: bf16[64,128], index: 11, kind: output, shape index: {}]  }
   0x1   :  { %17 = vsyncpa [#allocation6], 0 }
   0x2   :  { %18 = vsyncpa [#allocation4], 0 }
   0x3   :  { %20 = vsyncpa [#allocation4 + $0x1], 0  ;;  %s2254_s17 = smov 0   ;;  %s2256_s18 = smov 0  }
   0x4   :  { %s2258_s19 = smov 0   ;;  %s2260_s20 = smov 0  }
   0x5 LB: > { %2765 = sst [smem:[#allocation11_spill]] %s2177_s19  ;;  %s2275_s21 = sadd.s32 4294967295, %s2181_s20   ;;  %s2181_s20 = sphi %s2260_s20, %s2777_s20   ;;  %s2177_s19 = sphi %s2258_s19, %s2779_s19   ;;  %s2173_s18 = sphi %s2256_s18, %s2781_s18   ;;  %s2169_s17 = sphi %s2254_s17, %s2780_s17  }
   0x6   : > { %s1725_s22 = sadd.s32 4294967294, %s2181_s20   ;;  %s2279_s23 = sadd.s32 1, %s2181_s20  }
   0x7   : > { %2766 = sst [smem:[#allocation12_spill]] %s2279_s23  ;;  %s269_s24 = sadd.s32 1, %s2177_s19 }
   0x8   : > { %s266_s25 = ssub.s32 %s2181_s20, %s2279_s23  ;;  %p279_p0 = scmp.ne.s32.totalorder %s2177_s19, %s2173_s18 }
   0x9   : > { %p267_p1 = scmp.eq.s32.totalorder %s266_s25, 0  ;;  %p280_p2 = scmp.eq.s32.totalorder %s2275_s21, 1 }
   0xa   : > { %p285_p3 = scmp.ne.s32.totalorder %s2173_s18, %s2169_s17  ;;  %p286_p4 = scmp.eq.s32.totalorder %s1725_s22, 1 }
   0xb   : > { %s2290_s26 = scalar_select %p267_p1, %s2177_s19, %s269_s24  }
   0xc   : > { %p2292_p5 = por %p280_p2, %p279_p0  ;;  %p2296_p6 = por %p286_p4, %p285_p3 }
   0xd   : > { %2767 = sst [smem:[#allocation13_spill]] %s2290_s26  ;;  %p1726_p7 = scmp.ge.s32.totalorder %s2181_s20, 1 }
   0xe   : > { %s2769_s28 = scalar_select %p2296_p6, 1, 0 }
   0xf   : > { %p293_p8 = scmp.lt.s32.totalorder %s2181_s20, 3  ;;  %p2761_p9 = scmp.eq.s32.totalorder %s2275_s21, 0 }
  0x10   : > { %s2183_s30 = smov [#allocation2]   ;;  %s2184_s14 = smov [#allocation5]  }
  0x11   : > { %p2303_p10 = pnand %p1726_p7, %p293_p8  ;;  %s311_s12 = sshll.u32 %s2183_s30, 4  ;;  %s312_s12 = int_to_ptr.vmem [resolvable:$true] %s311_s12 }
  0x12   : > { %s339_s15 = sshll.u32 %s2184_s14, 4  ;;  %s2072_s16 = scalar_lea.vmem %s312_s12, 1024  ;;  %s340_s15 = int_to_ptr.vmem [resolvable:$true] %s339_s15 }
  0x13   : > { %p1886_p11 = pneg %p2303_p10  ;;  %p2073_p0 = scmp.ne.s32.totalorder %s312_s12, %s2072_s16 }
  0x14   : > { %p2080_p3 = scmp.lt.s32.totalorder %s312_s12, %s312_s12  ;;  %p2081_p4 = scmp.lt.s32.totalorder %s2072_s16, %s2072_s16 }
  0x15   : > { %p2311_p12 = pnand %p2761_p9, %p1886_p11 }
  0x16   : > { %p2082_p7 = por %p2081_p4, %p2080_p3 }
  0x17   : > { %p2063_p13 = pneg %p2311_p12 }
  0x19   : > { %p2075_p1 = pnand %p2073_p0, %p2063_p13 }
  0x1b   : > { %p2076_p2 = pneg %p2075_p1 }
  0x1d   : > { %p2083_p8 = pnand %p2082_p7, %p2076_p2 }
  0x1f   : > { %2086 = shalt.err (!%p2083_p8)
}
  0x20   : > { %s2185_s22 = smov 128   ;;  %s2186_s24 = smov 8  }
  0x21   : > { %1889 = dma.hbm_to_vmem [thread:$0]  (!%p2311_p12), %s2752_s3, 1024, %s312_s12, [#allocation3], %s2185_s22, %s2185_s22, %s2186_s24  }
  0x22   : > { %s2098_s14 = scalar_lea.vmem %s340_s15, 512  ;;  %p2106_p9 = scmp.lt.s32.totalorder %s340_s15, %s340_s15 }
  0x23   : > { %p2099_p11 = scmp.ne.s32.totalorder %s340_s15, %s2098_s14  ;;  %p2107_p6 = scmp.lt.s32.totalorder %s2098_s14, %s2098_s14 }
  0x25   : > { %p2101_p0 = pnand %p2099_p11, %p2063_p13  ;;  %p2108_p3 = por %p2107_p6, %p2106_p9 }
  0x27   : > { %p2102_p1 = pneg %p2101_p0 }
  0x29   : > { %p2109_p2 = pnand %p2108_p3, %p2102_p1 }
  0x2b   : > { %2112 = shalt.err (!%p2109_p2)
}
  0x2c   : > { %s2187_s16 = smov 64   ;;  %s2188_s26 = smov 4  }
  0x2d   : > { %1892 = dma.hbm_to_vmem [thread:$0]  (!%p2311_p12), %s2758_s9, 512, %s340_s15, [#allocation6], %s2187_s16, %s2187_s16, %s2188_s26  }
  0x2e   : > { %367 = sbr.rel (%p2303_p10) target bundleno = 2360 (0x938), region = 64  ;;  %p2772_p4 = scmp.eq.s32.totalorder (!%p2303_p10), %s2275_s21, 0 }
  0x33   : > { %2156 = dma.done.wait (%p2772_p4), [#allocation3], 1024   ;;  %p2773_p13 = pmov %p2772_p4 }
  0x34   : > { %p2774_p6 = pmov %p2772_p4 }
  0x35   : > { %2158 = vsyncadd (%p2773_p13), [#allocation3], 4294966272 }
  0x36   : > { %2160 = dma.done.wait (%p2774_p6), [#allocation6], 512   ;;  %p2775_p9 = pmov %p2772_p4 }
  0x37   : > { %s1734_s12 = sshll.u32 %s2275_s21, 2  ;;  %v2189_v0 = vmov 1   ;;  %v2190_v1 = vmov 0   ;;  %v1736_v6 = vld [vmem:[%s2750_s1] ss:$0 sm:$0xff]  ;;  %vm492_vm0 = vcmask 523264  }
  0x38   : > { %2162 = vsyncadd (%p2775_p9), [#allocation6], 4294966784  ;;  %1945 = vset.pattern.permute.xlu1 %v2189_v0  ;;  %1944 = vset.pattern.permute.xlu0 %v2190_v1  ;;  %p412_p10 = scmp.lt.s32.totalorder %s1734_s12, 7  ;;  %v1738_v7 = vld [vmem:[%s2750_s1 + $0x1] ss:$0 sm:$0xff]  ;;  %s408_s25 = sand.u32 1, %s2173_s18  }
  0x39   : > { %697 = vmatprep.mubr.bf16.mxu0 %v2190_v1  ;;  %v1737_v9 = vld [vmem:[%s2751_s2] ss:$0 sm:$0xff]  ;;  %s1733_s30 = sshll.u32 %s408_s25, 4  ;;  %s1818_s23 = sshll.u32 %s2275_s21, 8 }
  0x3a   : > { %s2783_s12 = smov (!%p412_p10, %s1734_s12), 7  ;;  %s2707_s13 = scalar_lea.hbm %s2760_s11, %s1818_s23 }
  0x3b   : > { %s1735_s19 = sshll.u32 %s2783_s12, 3  ;;  %s410_s12 = scalar_lea.vmem [#allocation7], %s1733_s30 }
  0x3c   : > { %s415_s29 = scalar_lea.vmem %s2749_s0, %s1735_s19  ;;  %s1641_s19 = sshll.u32 %s410_s12, 4  ;;  %s2702_s19 = int_to_ptr.vmem [resolvable:$true] %s1641_s19 }
  0x3d   : > { %v419_v2 = vld [vmem:[%s415_s29] sm:$0xff]  ;;  %v420_v3 = vld [vmem:[%s415_s29 + $0x8] sm:$0xff]  ;;  %v421_v4 = vld [vmem:[%s415_s29 + $0x10] sm:$0xff]  ;;  %s2709_s15 = scalar_lea.sflag [#allocation4], %s408_s25  ;;  %s2113_s22 = scalar_lea.vmem %s2702_s19, 256 }
  0x3e   : > { %465 = vperm.xlu1 %1945, %v419_v2   ;;  %427 = vperm.xlu0 %1944, %v419_v2   ;;  %v422_v5 = vld [vmem:[%s415_s29 + $0x18] sm:$0xff]  ;;  %p2114_p12 = scmp.ne.s32.totalorder %s2702_s19, %s2113_s22  ;;  %s2191_s21 = smov [#allocation7]  }
  0x3f   : > { %s2117_s24 = sshll.u32 %s2191_s21, 4  ;;  %s2118_s24 = int_to_ptr.vmem [resolvable:$false] %s2117_s24 }
  0x40   : > { %p2115_p7 = pnand %p2114_p12, %p2292_p5  ;;  %s2119_s30 = scalar_lea.vmem %s2118_s24, 512 }
  0x41   : > { %p2120_p11 = scmp.lt.s32.totalorder %s2702_s19, %s2118_s24  ;;  %p2121_p0 = scmp.lt.s32.totalorder %s2119_s30, %s2113_s22 }
  0x42   : > { %469 = vperm.xlu1 %1945, %v420_v3   ;;  %432 = vperm.xlu0 %1944, %v420_v3   ;;  %p2116_p8 = pneg %p2115_p7 }
  0x43   : > { %p2122_p1 = por %p2121_p0, %p2120_p11 }
  0x45   : > { %p2123_p3 = pnand %p2122_p1, %p2116_p8 }
  0x46   : > { %1946 = vset.pattern.permute.xlu1 %v2190_v1  ;;  %437 = vperm.xlu0 %1944, %v421_v4  }
  0x47   : > { %442 = vperm.xlu1 %1946, %v422_v5  }
  0x4a   : > { %1947 = vset.pattern.permute.xlu0 %v2189_v0 }
  0x4b   : > { %1948 = vset.pattern.permute.xlu1 %v2189_v0  ;;  %473 = vperm.xlu0 %1947, %v421_v4  }
  0x4c   : > { %477 = vperm.xlu1 %1948, %v422_v5  }
  0xb9   : > { %v466_v8 = vpop.permute.xlu1 %465  ;;  %v428_v10 = vpop.permute.xlu0 %427 }
  0xba   : > { %v449_v11 = vmul.f32 %v1736_v6, %v428_v10  ;;  %v484_v12 = vmul.f32 %v1738_v7, %v466_v8 }
  0xbc   : > { %v459_v13 = vadd.f32 %v1737_v9, %v449_v11 }
  0xbd   : > { %v470_v14 = vpop.permute.xlu1 %469  ;;  %v433_v15 = vpop.permute.xlu0 %432 }
  0xbe   : > { %v450_v16 = vmul.f32 %v1736_v6, %v433_v15  ;;  %v488_v17 = vadd.f32 %v484_v12, %v459_v13  ;;  %v485_v18 = vmul.f32 %v1738_v7, %v470_v14 }
  0xc0   : > { %v460_v19 = vadd.f32 %v1737_v9, %v450_v16  ;;  %v493_v20 = vsel %vm492_vm0, %v488_v17, 0.0 }
  0xc1   : > { %494 = vadd.xlane.f32.xlu1 %v493_v20  ;;  %v438_v21 = vpop.permute.xlu0 %437  ;;  %v1952_v20 = vld [vmem:[#allocation2 + $0x24] ss:$8 sps:$4 sm:$0xff]  }
  0xc2   : > { %v443_v22 = vpop.permute.xlu1 %442  ;;  %v489_v23 = vadd.f32 %v485_v18, %v460_v19  ;;  %v451_v24 = vmul.f32 %v1736_v6, %v438_v21  ;;  %v1949_v18 = vld [vmem:[#allocation2 + $0x34] ss:$8 sps:$4 sm:$0xff]   ;;  %v1951_v19 = vld [vmem:[#allocation2 + $0x30] ss:$8 sps:$4 sm:$0xff]   ;;  %v1954_v21 = vld [vmem:[#allocation2 + $0x20] ss:$8 sps:$4 sm:$0xff]  }
  0xc3   : > { %v452_v25 = vmul.f32 %v1736_v6, %v443_v22  ;;  %673 = vmatprep.subr.bf16.mxu0 %v1949_v18  ;;  %v1955_v22 = vld [vmem:[#allocation2 + $0x14] ss:$8 sps:$4 sm:$0xff]  }
  0xc4   : > { %v496_v26 = vsel %vm492_vm0, %v489_v23, 0.0  ;;  %v461_v28 = vadd.f32 %v1737_v9, %v451_v24  ;;  %674 = vmatpush1.bf16.msra.mxu0 %v1951_v19  ;;  %v1958_v24 = vld [vmem:[#allocation2 + $0x4] ss:$8 sps:$4 sm:$0xff]  }
  0xc5   : > { %497 = vadd.xlane.f32.xlu0 %v496_v26  ;;  %v462_v31 = vadd.f32 %v1737_v9, %v452_v25  ;;  %675 = vmatprep.subr.bf16.mxu0 %v1952_v20  ;;  %v1960_v25 = vld [vmem:[#allocation2] ss:$8 sps:$4 sm:$0xff]  }
  0xc6   : > { %v474_v27 = vpop.permute.xlu0 %473 }
  0xc7   : > { %v486_v29 = vmul.f32 %v1738_v7, %v474_v27  ;;  %v478_v30 = vpop.permute.xlu1 %477 }
  0xc8   : > { %v487_v32 = vmul.f32 %v1738_v7, %v478_v30  ;;  %676 = vmatpush1.bf16.msra.mxu0 %v1954_v21 }
  0xc9   : > { %v490_v33 = vadd.f32 %v486_v29, %v461_v28  ;;  %677 = vmatprep.subr.bf16.mxu0 %v1955_v22 }
  0xca   : > { %v491_v34 = vadd.f32 %v487_v32, %v462_v31 }
  0xcb   : > { %v499_v35 = vsel %vm492_vm0, %v490_v33, 0.0 }
  0xcc   : > { %500 = vadd.xlane.f32.xlu0 %v499_v35  ;;  %v502_v36 = vsel %vm492_vm0, %v491_v34, 0.0 }
  0xcd   : > { %503 = vadd.xlane.f32.xlu1 %v502_v36 }
 0x14a   : > { %v495_v37 = vpop.xlane.xlu1 %494 }
 0x14b   : > { %v505_v38 = vrot.slane %v495_v37, 4 }
 0x14d   : > { %v506_v39 = vadd.f32 %v505_v38, %v495_v37 }
 0x14e   : > { %v498_v40 = vpop.xlane.xlu0 %497 }
 0x14f   : > { %v507_v41 = vrot.slane %v506_v39, 2  ;;  %v511_v42 = vrot.slane %v498_v40, 4 }
 0x151   : > { %v508_v43 = vadd.f32 %v507_v41, %v506_v39  ;;  %v512_v44 = vadd.f32 %v511_v42, %v498_v40 }
 0x153   : > { %v509_v45 = vrot.slane %v508_v43, 1  ;;  %v513_v46 = vrot.slane %v512_v44, 2 }
 0x155   : > { %v510_v47 = vadd.f32 %v509_v45, %v508_v43  ;;  %v514_v48 = vadd.f32 %v513_v46, %v512_v44  ;;  %v501_v49 = vpop.xlane.xlu0 %500 }
 0x156   : > { %v517_v50 = vrot.slane %v501_v49, 4  ;;  %v504_v51 = vpop.xlane.xlu1 %503 }
 0x157   : > { %v529_v52 = vmul.f32 0.001953125, %v510_v47  ;;  %v515_v53 = vrot.slane %v514_v48, 1  ;;  %v523_v54 = vrot.slane %v504_v51, 4 }
 0x158   : > { %v518_v55 = vadd.f32 %v517_v50, %v501_v49 }
 0x159   : > { %v516_v56 = vadd.f32 %v515_v53, %v514_v48  ;;  %v524_v57 = vadd.f32 %v523_v54, %v504_v51  ;;  %v2363_v58 = vsub.f32 %v488_v17, %v529_v52 }
 0x15a   : > { %v519_v59 = vrot.slane %v518_v55, 2 }
 0x15b   : > { %v530_v60 = vmul.f32 0.001953125, %v516_v56  ;;  %v525_v61 = vrot.slane %v524_v57, 2  ;;  %v537_v62 = vmul.f32 %v2363_v58, %v2363_v58 }
 0x15c   : > { %v520_v63 = vadd.f32 %v519_v59, %v518_v55 }
 0x15d   : > { %v526_v0 = vadd.f32 %v525_v61, %v524_v57  ;;  %v541_v2 = vsel %vm492_vm0, %v537_v62, 0.0  ;;  %v2368_v3 = vsub.f32 %v489_v23, %v530_v60  ;;  %v1957_v23 = vld [vmem:[#allocation2 + $0x10] ss:$8 sps:$4 sm:$0xff]  }
 0x15e   : > { %v521_v4 = vrot.slane %v520_v63, 1  ;;  %542 = vadd.xlane.f32.xlu0 %v541_v2  ;;  %678 = vmatpush1.bf16.msra.mxu0 %v1957_v23 }
 0x15f   : > { %v527_v5 = vrot.slane %v526_v0, 1  ;;  %v538_v6 = vmul.f32 %v2368_v3, %v2368_v3  ;;  %679 = vmatprep.subr.bf16.mxu0 %v1958_v24 }
 0x160   : > { %v522_v7 = vadd.f32 %v521_v4, %v520_v63 }
 0x161   : > { %v528_v8 = vadd.f32 %v527_v5, %v526_v0  ;;  %v544_v9 = vsel %vm492_vm0, %v538_v6, 0.0 }
 0x162   : > { %v531_v10 = vmul.f32 0.001953125, %v522_v7  ;;  %545 = vadd.xlane.f32.xlu1 %v544_v9  ;;  %680 = vmatpush1.bf16.msra.mxu0 %v1960_v25 }
 0x163   : > { %v532_v11 = vmul.f32 0.001953125, %v528_v8 }
 0x164   : > { %v2373_v12 = vsub.f32 %v490_v33, %v531_v10 }
 0x165   : > { %v2375_v13 = vsub.f32 %v491_v34, %v532_v11 }
 0x166   : > { %v539_v14 = vmul.f32 %v2373_v12, %v2373_v12 }
 0x167   : > { %v540_v15 = vmul.f32 %v2375_v13, %v2375_v13 }
 0x168   : > { %v547_v16 = vsel %vm492_vm0, %v539_v14, 0.0 }
 0x169   : > { %548 = vadd.xlane.f32.xlu0 %v547_v16  ;;  %v550_v17 = vsel %vm492_vm0, %v540_v15, 0.0 }
 0x16a   : > { %551 = vadd.xlane.f32.xlu1 %v550_v17 }
 0x1e7   : > { %v543_v26 = vpop.xlane.xlu0 %542 }
 0x1e8   : > { %v553_v27 = vrot.slane %v543_v26, 4 }
 0x1ea   : > { %v554_v28 = vadd.f32 %v553_v27, %v543_v26 }
 0x1eb   : > { %v546_v29 = vpop.xlane.xlu1 %545 }
 0x1ec   : > { %v555_v30 = vrot.slane %v554_v28, 2  ;;  %v559_v31 = vrot.slane %v546_v29, 4 }
 0x1ee   : > { %v556_v32 = vadd.f32 %v555_v30, %v554_v28  ;;  %v560_v33 = vadd.f32 %v559_v31, %v546_v29 }
 0x1f0   : > { %v557_v34 = vrot.slane %v556_v32, 1  ;;  %v561_v35 = vrot.slane %v560_v33, 2 }
 0x1f2   : > { %v558_v36 = vadd.f32 %v557_v34, %v556_v32  ;;  %v562_v37 = vadd.f32 %v561_v35, %v560_v33  ;;  %v549_v38 = vpop.xlane.xlu0 %548 }
 0x1f3   : > { %v565_v39 = vrot.slane %v549_v38, 4  ;;  %v552_v40 = vpop.xlane.xlu1 %551 }
 0x1f4   : > { %v577_v41 = vmul.f32 0.001953125, %v558_v36  ;;  %v563_v42 = vrot.slane %v562_v37, 1  ;;  %v571_v43 = vrot.slane %v552_v40, 4 }
 0x1f5   : > { %v566_v44 = vadd.f32 %v565_v39, %v549_v38  ;;  %v1961_v39 = vld [vmem:[%s2754_s5 + $0x74] ss:$8 sps:$4 sm:$0xff]  }
 0x1f6   : > { %v581_v45 = vadd.f32 1e-05, %v577_v41  ;;  %v564_v46 = vadd.f32 %v563_v42, %v562_v37  ;;  %v572_v47 = vadd.f32 %v571_v43, %v552_v40  ;;  %v1963_v40 = vld [vmem:[%s2754_s5 + $0x70] ss:$8 sps:$4 sm:$0xff]   ;;  %v1964_v41 = vld [vmem:[%s2754_s5 + $0x64] ss:$8 sps:$4 sm:$0xff]   ;;  %1046 = vmatprep.subr.bf16.mxu1 %v1961_v39 }
 0x1f7   : > { %v567_v48 = vrot.slane %v566_v44, 2  ;;  %1047 = vmatpush1.bf16.msra.mxu1 %v1963_v40  ;;  %v1966_v42 = vld [vmem:[%s2754_s5 + $0x60] ss:$8 sps:$4 sm:$0xff]   ;;  %v1967_v43 = vld [vmem:[%s2754_s5 + $0x54] ss:$8 sps:$4 sm:$0xff]  }
 0x1f8   : > { %2029 = vrsqrt.f32 %v581_v45  ;;  %v578_v49 = vmul.f32 0.001953125, %v564_v46  ;;  %v573_v50 = vrot.slane %v572_v47, 2  ;;  %1048 = vmatprep.subr.bf16.mxu1 %v1964_v41  ;;  %v1970_v45 = vld [vmem:[%s2754_s5 + $0x44] ss:$8 sps:$4 sm:$0xff]   ;;  %v1972_v46 = vld [vmem:[%s2754_s5 + $0x40] ss:$8 sps:$4 sm:$0xff]  }
 0x1f9   : > { %v568_v51 = vadd.f32 %v567_v48, %v566_v44  ;;  %v1969_v44 = vld [vmem:[%s2754_s5 + $0x50] ss:$8 sps:$4 sm:$0xff]  }
 0x1fa   : > { %v582_v52 = vadd.f32 1e-05, %v578_v49  ;;  %v574_v53 = vadd.f32 %v573_v50, %v572_v47  ;;  %v1973_v47 = vld [vmem:[%s2754_s5 + $0x34] ss:$8 sps:$4 sm:$0xff]   ;;  %v1975_v48 = vld [vmem:[%s2754_s5 + $0x30] ss:$8 sps:$4 sm:$0xff]  }
 0x1fb   : > { %v569_v54 = vrot.slane %v568_v51, 1  ;;  %1049 = vmatpush1.bf16.msra.mxu1 %v1966_v42  ;;  %v1976_v49 = vld [vmem:[%s2754_s5 + $0x24] ss:$8 sps:$4 sm:$0xff]   ;;  %v1978_v50 = vld [vmem:[%s2754_s5 + $0x20] ss:$8 sps:$4 sm:$0xff]  }
 0x1fc   : > { %2031 = vrsqrt.f32 %v582_v52  ;;  %v575_v55 = vrot.slane %v574_v53, 1  ;;  %1050 = vmatprep.subr.bf16.mxu1 %v1967_v43 }
 0x1fd   : > { %v570_v56 = vadd.f32 %v569_v54, %v568_v51 }
 0x1fe   : > { %v576_v57 = vadd.f32 %v575_v55, %v574_v53 }
 0x1ff   : > { %v579_v59 = vmul.f32 0.001953125, %v570_v56  ;;  %1051 = vmatpush1.bf16.msra.mxu1 %v1969_v44  ;;  %v1979_v44 = vld [vmem:[%s2754_s5 + $0x14] ss:$8 sps:$4 sm:$0xff]  }
 0x200   : > { %v580_v60 = vmul.f32 0.001953125, %v576_v57  ;;  %1052 = vmatprep.subr.bf16.mxu1 %v1970_v45  ;;  %v1984_v45 = vld [vmem:[%s2754_s5] ss:$8 sps:$4 sm:$0xff]  }
 0x201   : > { %v583_v61 = vadd.f32 1e-05, %v579_v59 }
 0x202   : > { %v584_v62 = vadd.f32 1e-05, %v580_v60 }
 0x203   : > { %2033 = vrsqrt.f32 %v583_v61  ;;  %1053 = vmatpush1.bf16.msra.mxu1 %v1972_v46  ;;  %v1985_v46 = vld [vmem:[%s2754_s5 + $0xf4] ss:$8 sps:$4 sm:$0xff]  }
 0x204   : > { %2035 = vrsqrt.f32 %v584_v62  ;;  %1054 = vmatprep.subr.bf16.mxu1 %v1973_v47  ;;  %v1987_v47 = vld [vmem:[%s2754_s5 + $0xf0] ss:$8 sps:$4 sm:$0xff]  }
 0x205   : > { %v2030_v63 = vpop.eup %2029 }
 0x206   : > { %v589_v0 = vmul.f32 %v2030_v63, %v2363_v58  ;;  %v609_v58 = vlaneseq }
 0x207   : > { %1055 = vmatpush1.bf16.msra.mxu1 %v1975_v48  ;;  %v1988_v48 = vld [vmem:[%s2754_s5 + $0xe4] ss:$8 sps:$4 sm:$0xff]  }
 0x208   : > { %v593_v5 = vmax.f32 %v589_v0, 0.0  ;;  %1056 = vmatprep.subr.bf16.mxu1 %v1976_v49  ;;  %v1990_v49 = vld [vmem:[%s2754_s5 + $0xe0] ss:$8 sps:$4 sm:$0xff]  }
 0x209   : > { %v2032_v2 = vpop.eup %2031 }
 0x20a   : > { %v590_v4 = vmul.f32 %v2032_v2, %v2368_v3  ;;  %v2390_v3 = vshrl.u32 %v609_v58, 7 }
 0x20b   : > { %1057 = vmatpush1.bf16.msra.mxu1 %v1978_v50  ;;  %v1991_v50 = vld [vmem:[%s2754_s5 + $0xd4] ss:$8 sps:$4 sm:$0xff]  }
 0x20c   : > { %v594_v6 = vmax.f32 %v590_v4, 0.0  ;;  %v611_v17 = vsub.s32 0, %v2390_v3  ;;  %v615_v18 = vsub.s32 1, %v2390_v3  ;;  %1058 = vmatprep.subr.bf16.mxu1 %v1979_v44 }
 0x20e   : > { %v597_v7 = vpack.c.bf16 %v594_v6, %v593_v5 }
 0x210   : > { %v2034_v8 = vpop.eup %2033  ;;  %1747 = vmatmul.mubr.msk.bf16.vlgmr.msra.gmra.mxu0 %vm492_vm0, %v597_v7 }
 0x211   : > { %v2036_v9 = vpop.eup %2035  ;;  %707 = vmatprep.mubr.bf16.mxu0 %v2190_v1  ;;  %v591_v10 = vmul.f32 %v2034_v8, %v2373_v12  ;;  %v607_v1 = vld [vmem:[%s2753_s4] sm:$0x3] }
 0x212   : > { %v592_v11 = vmul.f32 %v2036_v9, %v2375_v13  ;;  %v612_v12 = vrot.slane %v607_v1, %v611_v17  ;;  %v616_v13 = vrot.slane %v607_v1, %v615_v18 }
 0x213   : > { %v595_v14 = vmax.f32 %v591_v10, 0.0 }
 0x214   : > { %v596_v15 = vmax.f32 %v592_v11, 0.0 }
 0x216   : > { %v598_v16 = vpack.c.bf16 %v596_v15, %v595_v14 }
 0x218   : > { %1748 = vmatmul.mubr.msk.bf16.gmra.mxu0 %vm492_vm0, %v598_v16 }
 0x2d0   : > { %v699_v19 = vpop.f32.mrf.mxu0 }
 0x2d1   : > { %v2401_v21 = vadd.f32 %v699_v19, %v612_v12 }
 0x2d2   : > { %v701_v20 = vpop.f32.mrf.mxu0 }
 0x2d3   : > { %v2403_v22 = vadd.f32 %v701_v20, %v616_v13 }
 0x2d4   : > { %v703_v23 = vpop.f32.mrf.mxu0 }
 0x2d5   : > { %v718_v24 = vadd.f32 %v2403_v22, %v2401_v21  ;;  %v2407_v26 = vadd.f32 %v703_v23, %v612_v12 }
 0x2d6   : > { %v705_v25 = vpop.f32.mrf.mxu0 }
 0x2d7   : > { %v2409_v27 = vadd.f32 %v705_v25, %v616_v13  ;;  %719 = vadd.xlane.f32.xlu0 %v718_v24 }
 0x2d8   : > { %v709_v28 = vpop.f32.mrf.mxu0 }
 0x2d9   : > { %v721_v29 = vadd.f32 %v2409_v27, %v2407_v26  ;;  %v2413_v31 = vadd.f32 %v709_v28, %v612_v12 }
 0x2da   : > { %v711_v30 = vpop.f32.mrf.mxu0 }
 0x2db   : > { %v2415_v32 = vadd.f32 %v711_v30, %v616_v13  ;;  %722 = vadd.xlane.f32.xlu1 %v721_v29 }
 0x2dc   : > { %v713_v33 = vpop.f32.mrf.mxu0 }
 0x2dd   : > { %v724_v34 = vadd.f32 %v2415_v32, %v2413_v31  ;;  %v2419_v36 = vadd.f32 %v713_v33, %v612_v12 }
 0x2de   : > { %v715_v35 = vpop.f32.mrf.mxu0 }
 0x2df   : > { %v2421_v37 = vadd.f32 %v715_v35, %v616_v13  ;;  %725 = vadd.xlane.f32.xlu0 %v724_v34 }
 0x2e1   : > { %v727_v38 = vadd.f32 %v2421_v37, %v2419_v36 }
 0x2e3   : > { %728 = vadd.xlane.f32.xlu1 %v727_v38 }
 0x360   : > { %v720_v51 = vpop.xlane.xlu0 %719 }
 0x361   : > { %v730_v52 = vrot.slane %v720_v51, 4 }
 0x363   : > { %v731_v53 = vadd.f32 %v730_v52, %v720_v51  ;;  %v1993_v51 = vld [vmem:[%s2754_s5 + $0xd0] ss:$8 sps:$4 sm:$0xff]   ;;  %v1994_v52 = vld [vmem:[%s2754_s5 + $0xc4] ss:$8 sps:$4 sm:$0xff]  }
 0x364   : > { %v723_v54 = vpop.xlane.xlu1 %722 }
 0x365   : > { %v732_v55 = vrot.slane %v731_v53, 2  ;;  %v736_v56 = vrot.slane %v723_v54, 4 }
 0x367   : > { %v733_v57 = vadd.f32 %v732_v55, %v731_v53  ;;  %v737_v59 = vadd.f32 %v736_v56, %v723_v54  ;;  %v1996_v53 = vld [vmem:[%s2754_s5 + $0xc0] ss:$8 sps:$4 sm:$0xff]   ;;  %v1997_v54 = vld [vmem:[%s2754_s5 + $0xb4] ss:$8 sps:$4 sm:$0xff]   ;;  %v1999_v55 = vld [vmem:[%s2754_s5 + $0xb0] ss:$8 sps:$4 sm:$0xff]  }
 0x368   : > { %v726_v60 = vpop.xlane.xlu0 %725  ;;  %v2000_v56 = vld [vmem:[%s2754_s5 + $0xa4] ss:$8 sps:$4 sm:$0xff]  }
 0x369   : > { %v734_v61 = vrot.slane %v733_v57, 1  ;;  %v738_v62 = vrot.slane %v737_v59, 2  ;;  %v742_v63 = vrot.slane %v726_v60, 4 }
 0x36b   : > { %v735_v0 = vadd.f32 %v734_v61, %v733_v57  ;;  %v739_v2 = vadd.f32 %v738_v62, %v737_v59  ;;  %v743_v4 = vadd.f32 %v742_v63, %v726_v60  ;;  %v2002_v57 = vld [vmem:[%s2754_s5 + $0xa0] ss:$8 sps:$4 sm:$0xff]   ;;  %v2003_v59 = vld [vmem:[%s2754_s5 + $0x94] ss:$8 sps:$4 sm:$0xff]   ;;  %v2005_v60 = vld [vmem:[%s2754_s5 + $0x90] ss:$8 sps:$4 sm:$0xff]  }
 0x36c   : > { %v729_v5 = vpop.xlane.xlu1 %728  ;;  %v2006_v61 = vld [vmem:[%s2754_s5 + $0x84] ss:$8 sps:$4 sm:$0xff]   ;;  %v2008_v62 = vld [vmem:[%s2754_s5 + $0x80] ss:$8 sps:$4 sm:$0xff]  }
 0x36d   : > { %v754_v6 = vmul.f32 0.00048828125, %v735_v0  ;;  %v740_v7 = vrot.slane %v739_v2, 1  ;;  %v744_v8 = vrot.slane %v743_v4, 2  ;;  %v748_v9 = vrot.slane %v729_v5, 4 }
 0x36f   : > { %v741_v10 = vadd.f32 %v740_v7, %v739_v2  ;;  %v745_v11 = vadd.f32 %v744_v8, %v743_v4  ;;  %v749_v14 = vadd.f32 %v748_v9, %v729_v5  ;;  %v2462_v15 = vsub.f32 %v2401_v21, %v754_v6 }
 0x370   : > { %v2465_v16 = vsub.f32 %v2403_v22, %v754_v6 }
 0x371   : > { %v755_v58 = vmul.f32 0.00048828125, %v741_v10  ;;  %v746_v1 = vrot.slane %v745_v11, 1  ;;  %v750_v12 = vrot.slane %v749_v14, 2  ;;  %v766_v13 = vmul.f32 %v2462_v15, %v2462_v15 }
 0x372   : > { %v767_v19 = vmul.f32 %v2465_v16, %v2465_v16 }
 0x373   : > { %v747_v20 = vadd.f32 %v746_v1, %v745_v11  ;;  %v751_v23 = vadd.f32 %v750_v12, %v749_v14  ;;  %v2472_v24 = vsub.f32 %v2407_v26, %v755_v58  ;;  %v2475_v21 = vsub.f32 %v2409_v27, %v755_v58 }
 0x374   : > { %v774_v25 = vadd.f32 %v767_v19, %v766_v13 }
 0x375   : > { %v756_v22 = vmul.f32 0.00048828125, %v747_v20  ;;  %v752_v28 = vrot.slane %v751_v23, 1  ;;  %v768_v29 = vmul.f32 %v2472_v24, %v2472_v24  ;;  %v769_v30 = vmul.f32 %v2475_v21, %v2475_v21 }
 0x376   : > { %775 = vadd.xlane.f32.xlu0 %v774_v25 }
 0x377   : > { %v753_v33 = vadd.f32 %v752_v28, %v751_v23  ;;  %v777_v34 = vadd.f32 %v769_v30, %v768_v29  ;;  %v2482_v35 = vsub.f32 %v2413_v31, %v756_v22  ;;  %v2485_v26 = vsub.f32 %v2415_v32, %v756_v22 }
 0x379   : > { %v757_v27 = vmul.f32 0.00048828125, %v753_v33  ;;  %778 = vadd.xlane.f32.xlu1 %v777_v34  ;;  %v770_v38 = vmul.f32 %v2482_v35, %v2482_v35  ;;  %v771_v39 = vmul.f32 %v2485_v26, %v2485_v26 }
 0x37b   : > { %v780_v40 = vadd.f32 %v771_v39, %v770_v38  ;;  %v2492_v41 = vsub.f32 %v2419_v36, %v757_v27  ;;  %v2495_v42 = vsub.f32 %v2421_v37, %v757_v27  ;;  %v1981_v36 = vld [vmem:[%s2754_s5 + $0x10] ss:$8 sps:$4 sm:$0xff]   ;;  %v1982_v37 = vld [vmem:[%s2754_s5 + $0x4] ss:$8 sps:$4 sm:$0xff]  }
 0x37c   : > { %1059 = vmatpush1.bf16.msra.mxu1 %v1981_v36 }
 0x37d   : > { %781 = vadd.xlane.f32.xlu0 %v780_v40  ;;  %v772_v31 = vmul.f32 %v2492_v41, %v2492_v41  ;;  %v773_v32 = vmul.f32 %v2495_v42, %v2495_v42  ;;  %1060 = vmatprep.subr.bf16.mxu1 %v1982_v37 }
 0x37f   : > { %v783_v43 = vadd.f32 %v773_v32, %v772_v31 }
 0x380   : > { %1061 = vmatpush1.bf16.msra.mxu1 %v1984_v45 }
 0x381   : > { %784 = vadd.xlane.f32.xlu1 %v783_v43  ;;  %1062 = vmatprep.subr.bf16.mxu1 %v1985_v46 }
 0x384   : > { %1063 = vmatpush2.bf16.msra.mxu1 %v1987_v47 }
 0x385   : > { %1064 = vmatprep.subr.bf16.mxu1 %v1988_v48 }
 0x388   : > { %1065 = vmatpush2.bf16.msra.mxu1 %v1990_v49 }
 0x389   : > { %1066 = vmatprep.subr.bf16.mxu1 %v1991_v50 }
 0x38c   : > { %1067 = vmatpush2.bf16.msra.mxu1 %v1993_v51 }
 0x38d   : > { %1068 = vmatprep.subr.bf16.mxu1 %v1994_v52 }
 0x390   : > { %1069 = vmatpush2.bf16.msra.mxu1 %v1996_v53 }
 0x391   : > { %1070 = vmatprep.subr.bf16.mxu1 %v1997_v54 }
 0x394   : > { %1071 = vmatpush2.bf16.msra.mxu1 %v1999_v55 }
 0x395   : > { %1072 = vmatprep.subr.bf16.mxu1 %v2000_v56 }
 0x398   : > { %1073 = vmatpush2.bf16.msra.mxu1 %v2002_v57 }
 0x399   : > { %1074 = vmatprep.subr.bf16.mxu1 %v2003_v59 }
 0x39c   : > { %1075 = vmatpush2.bf16.msra.mxu1 %v2005_v60 }
 0x39d   : > { %1076 = vmatprep.subr.bf16.mxu1 %v2006_v61 }
 0x3a0   : > { %1077 = vmatpush2.bf16.msra.mxu1 %v2008_v62 }
 0x3ff   : > { %v776_v63 = vpop.xlane.xlu0 %775 }
 0x400   : > { %v786_v0 = vrot.slane %v776_v63, 4 }
 0x402   : > { %v787_v2 = vadd.f32 %v786_v0, %v776_v63  ;;  %v779_v4 = vpop.xlane.xlu1 %778 }
 0x403   : > { %v792_v5 = vrot.slane %v779_v4, 4 }
 0x404   : > { %v788_v6 = vrot.slane %v787_v2, 2 }
 0x405   : > { %v793_v7 = vadd.f32 %v792_v5, %v779_v4 }
 0x406   : > { %v789_v8 = vadd.f32 %v788_v6, %v787_v2  ;;  %v782_v9 = vpop.xlane.xlu0 %781 }
 0x407   : > { %v794_v10 = vrot.slane %v793_v7, 2  ;;  %v798_v11 = vrot.slane %v782_v9, 4 }
 0x408   : > { %v790_v14 = vrot.slane %v789_v8, 1 }
 0x409   : > { %v795_v58 = vadd.f32 %v794_v10, %v793_v7  ;;  %v799_v1 = vadd.f32 %v798_v11, %v782_v9 }
 0x40a   : > { %v791_v12 = vadd.f32 %v790_v14, %v789_v8  ;;  %v785_v13 = vpop.xlane.xlu1 %784 }
 0x40b   : > { %v796_v19 = vrot.slane %v795_v58, 1  ;;  %v800_v20 = vrot.slane %v799_v1, 2  ;;  %v804_v23 = vrot.slane %v785_v13, 4 }
 0x40c   : > { %v810_v25 = vmul.f32 0.00048828125, %v791_v12 }
 0x40d   : > { %v797_v22 = vadd.f32 %v796_v19, %v795_v58  ;;  %v801_v28 = vadd.f32 %v800_v20, %v799_v1  ;;  %v805_v29 = vadd.f32 %v804_v23, %v785_v13 }
 0x40e   : > { %v814_v30 = vadd.f32 1e-05, %v810_v25 }
 0x40f   : > { %v811_v33 = vmul.f32 0.00048828125, %v797_v22  ;;  %v802_v34 = vrot.slane %v801_v28, 1  ;;  %v806_v27 = vrot.slane %v805_v29, 2 }
 0x410   : > { %2037 = vrsqrt.f32 %v814_v30 }
 0x411   : > { %v815_v38 = vadd.f32 1e-05, %v811_v33  ;;  %v803_v39 = vadd.f32 %v802_v34, %v801_v28  ;;  %v807_v40 = vadd.f32 %v806_v27, %v805_v29 }
 0x413   : > { %2039 = vrsqrt.f32 %v815_v38  ;;  %v812_v31 = vmul.f32 0.00048828125, %v803_v39  ;;  %v808_v32 = vrot.slane %v807_v40, 1 }
 0x415   : > { %v816_v43 = vadd.f32 1e-05, %v812_v31  ;;  %v809_v44 = vadd.f32 %v808_v32, %v807_v40 }
 0x417   : > { %2041 = vrsqrt.f32 %v816_v43  ;;  %v813_v36 = vmul.f32 0.00048828125, %v809_v44 }
 0x419   : > { %v817_v37 = vadd.f32 1e-05, %v813_v36 }
 0x41b   : > { %2043 = vrsqrt.f32 %v817_v37 }
 0x41d   : > { %v2038_v45 = vpop.eup %2037 }
 0x41e   : > { %v823_v46 = vmul.f32 %v2038_v45, %v2465_v16  ;;  %v822_v47 = vmul.f32 %v2038_v45, %v2462_v15 }
 0x420   : > { %v2040_v48 = vpop.eup %2039  ;;  %v831_v51 = vmax.f32 %v823_v46, 0.0  ;;  %v830_v53 = vmax.f32 %v822_v47, 0.0 }
 0x421   : > { %v825_v49 = vmul.f32 %v2040_v48, %v2475_v21  ;;  %v824_v50 = vmul.f32 %v2040_v48, %v2472_v24 }
 0x423   : > { %v833_v52 = vmax.f32 %v825_v49, 0.0  ;;  %v832_v54 = vmax.f32 %v824_v50, 0.0 }
 0x424   : > { %v2042_v55 = vpop.eup %2041 }
 0x425   : > { %v839_v56 = vpack.c.bf16 %v833_v52, %v831_v51  ;;  %v838_v57 = vpack.c.bf16 %v832_v54, %v830_v53  ;;  %v827_v59 = vmul.f32 %v2042_v55, %v2485_v26  ;;  %v826_v60 = vmul.f32 %v2042_v55, %v2482_v35  ;;  %v874_v26 = vld [vmem:[%s2755_s6] sm:$0x3] }
 0x426   : > { %v879_v35 = vrot.slane %v874_v26, %v611_v17 }
 0x427   : > { %1078 = vmatprep.mubr.bf16.mxu1 %v839_v56  ;;  %v835_v61 = vmax.f32 %v827_v59, 0.0  ;;  %v834_v62 = vmax.f32 %v826_v60, 0.0 }
 0x428   : > { %v2044_v16 = vpop.eup %2043  ;;  %1079 = vmatmul.mubr.bf16.vlgmr.msra.gmra.mxu1 %v838_v57 }
 0x429   : > { %v829_v15 = vmul.f32 %v2044_v16, %v2495_v42  ;;  %v828_v21 = vmul.f32 %v2044_v16, %v2492_v41  ;;  %v883_v42 = vrot.slane %v874_v26, %v615_v18 }
 0x42b   : > { %v837_v24 = vmax.f32 %v829_v15, 0.0  ;;  %v836_v63 = vmax.f32 %v828_v21, 0.0 }
 0x42d   : > { %v841_v0 = vpack.c.bf16 %v837_v24, %v835_v61  ;;  %v840_v2 = vpack.c.bf16 %v836_v63, %v834_v62 }
 0x42f   : > { %1088 = vmatprep.mubr.bf16.mxu1 %v841_v0 }
 0x430   : > { %1089 = vmatmul.mubr.bf16.gmra.mxu1 %v840_v2 }
 0x4e8   : > { %v1080_v4 = vpop.f32.mrf.mxu1 }
 0x4e9   : > { %v1081_v5 = vadd.f32 %v1080_v4, %v879_v35 }
 0x4ea   : > { %v1082_v41 = vpop.f32.mrf.mxu1 }
 0x4eb   : > { %v1083_v6 = vadd.f32 %v1082_v41, %v883_v42 }
 0x4ec   : > { %v1084_v7 = vpop.f32.mrf.mxu1 }
 0x4ed   : > { %v1099_v8 = vadd.f32 %v1083_v6, %v1081_v5  ;;  %v1085_v10 = vadd.f32 %v1084_v7, %v879_v35 }
 0x4ee   : > { %v1086_v9 = vpop.f32.mrf.mxu1 }
 0x4ef   : > { %v1087_v11 = vadd.f32 %v1086_v9, %v883_v42  ;;  %1100 = vadd.xlane.f32.xlu0 %v1099_v8 }
 0x4f0   : > { %v1090_v14 = vpop.f32.mrf.mxu1 }
 0x4f1   : > { %v1102_v58 = vadd.f32 %v1087_v11, %v1085_v10  ;;  %v1091_v12 = vadd.f32 %v1090_v14, %v879_v35  ;;  %v2010_v14 = vld [vmem:[%s2756_s7 + $0x38] sm:$0xff]  }
 0x4f2   : > { %v1092_v1 = vpop.f32.mrf.mxu1 }
 0x4f3   : > { %v1093_v13 = vadd.f32 %v1092_v1, %v883_v42  ;;  %1103 = vadd.xlane.f32.xlu1 %v1102_v58  ;;  %v2011_v58 = vld [vmem:[%s2756_s7 + $0x70] sm:$0xff]  }
 0x4f4   : > { %v1094_v17 = vpop.f32.mrf.mxu1  ;;  %v2012_v1 = vld [vmem:[%s2756_s7 + $0x30] sm:$0xff]  }
 0x4f5   : > { %v1105_v19 = vadd.f32 %v1093_v13, %v1091_v12  ;;  %v1095_v18 = vadd.f32 %v1094_v17, %v879_v35  ;;  %v2015_v17 = vld [vmem:[%s2756_s7 + $0x60] sm:$0xff]  }
 0x4f6   : > { %v1096_v3 = vpop.f32.mrf.mxu1 }
 0x4f7   : > { %v1097_v20 = vadd.f32 %v1096_v3, %v883_v42  ;;  %1106 = vadd.xlane.f32.xlu0 %v1105_v19  ;;  %v2016_v19 = vld [vmem:[%s2756_s7 + $0x20] sm:$0xff]   ;;  %v2017_v3 = vld [vmem:[%s2756_s7 + $0x58] sm:$0xff]  }
 0x4f9   : > { %v1108_v23 = vadd.f32 %v1097_v20, %v1095_v18 }
 0x4fb   : > { %1109 = vadd.xlane.f32.xlu1 %v1108_v23  ;;  %v2020_v23 = vld [vmem:[%s2756_s7 + $0x10] sm:$0xff]  }
 0x578   : > { %v1101_v25 = vpop.xlane.xlu0 %1100 }
 0x579   : > { %v1111_v22 = vrot.slane %v1101_v25, 4 }
 0x57b   : > { %v1112_v28 = vadd.f32 %v1111_v22, %v1101_v25  ;;  %v2021_v25 = vld [vmem:[%s2756_s7 + $0x48] sm:$0xff]  }
 0x57c   : > { %v1104_v29 = vpop.xlane.xlu1 %1103  ;;  %v2022_v22 = vld [vmem:[%s2756_s7 + $0x8] sm:$0xff]  }
 0x57d   : > { %v1113_v30 = vrot.slane %v1112_v28, 2  ;;  %v1117_v33 = vrot.slane %v1104_v29, 4 }
 0x57f   : > { %v1114_v34 = vadd.f32 %v1113_v30, %v1112_v28  ;;  %v1118_v27 = vadd.f32 %v1117_v33, %v1104_v29  ;;  %v2023_v28 = vld [vmem:[%s2756_s7 + $0x40] sm:$0xff]  }
 0x580   : > { %v1107_v38 = vpop.xlane.xlu0 %1106  ;;  %v2024_v29 = vld [vmem:[%s2756_s7] sm:$0xff]  }
 0x581   : > { %v1115_v39 = vrot.slane %v1114_v34, 1  ;;  %v1119_v40 = vrot.slane %v1118_v27, 2  ;;  %v1123_v31 = vrot.slane %v1107_v38, 4 }
 0x583   : > { %v1116_v32 = vadd.f32 %v1115_v39, %v1114_v34  ;;  %v1120_v43 = vadd.f32 %v1119_v40, %v1118_v27  ;;  %v1124_v44 = vadd.f32 %v1123_v31, %v1107_v38 }
 0x584   : > { %v1110_v36 = vpop.xlane.xlu1 %1109 }
 0x585   : > { %v1135_v37 = vmul.f32 0.00048828125, %v1116_v32  ;;  %v1121_v45 = vrot.slane %v1120_v43, 1  ;;  %v1125_v46 = vrot.slane %v1124_v44, 2  ;;  %v1129_v47 = vrot.slane %v1110_v36, 4 }
 0x587   : > { %v1122_v48 = vadd.f32 %v1121_v45, %v1120_v43  ;;  %v1126_v49 = vadd.f32 %v1125_v46, %v1124_v44  ;;  %v1130_v50 = vadd.f32 %v1129_v47, %v1110_v36  ;;  %v2576_v51 = vsub.f32 %v1081_v5, %v1135_v37 }
 0x588   : > { %v2578_v52 = vsub.f32 %v1083_v6, %v1135_v37 }
 0x589   : > { %v1136_v53 = vmul.f32 0.00048828125, %v1122_v48  ;;  %v1127_v54 = vrot.slane %v1126_v49, 1  ;;  %v1131_v55 = vrot.slane %v1130_v50, 2  ;;  %v1147_v56 = vmul.f32 %v2576_v51, %v2576_v51 }
 0x58a   : > { %v1148_v57 = vmul.f32 %v2578_v52, %v2578_v52 }
 0x58b   : > { %v1128_v59 = vadd.f32 %v1127_v54, %v1126_v49  ;;  %v1132_v60 = vadd.f32 %v1131_v55, %v1130_v50  ;;  %v2584_v16 = vsub.f32 %v1085_v10, %v1136_v53  ;;  %v2586_v15 = vsub.f32 %v1087_v11, %v1136_v53  ;;  %v2009_v11 = vld [vmem:[%s2756_s7 + $0x78] sm:$0xff]  }
 0x58c   : > { %v1155_v21 = vadd.f32 %v1148_v57, %v1147_v56  ;;  %1830 = vmatprep.subr.bf16.mxu0 %v2009_v11 }
 0x58d   : > { %v1137_v61 = vmul.f32 0.00048828125, %v1128_v59  ;;  %v1133_v24 = vrot.slane %v1132_v60, 1  ;;  %v1149_v62 = vmul.f32 %v2584_v16, %v2584_v16  ;;  %v1150_v63 = vmul.f32 %v2586_v15, %v2586_v15  ;;  %1831 = vmatpush3.bf16.msra.mxu0 %v2010_v14 }
 0x58e   : > { %1156 = vadd.xlane.f32.xlu0 %v1155_v21  ;;  %1832 = vmatprep.subr.bf16.mxu0 %v2011_v58 }
 0x58f   : > { %v1134_v0 = vadd.f32 %v1133_v24, %v1132_v60  ;;  %v1158_v2 = vadd.f32 %v1150_v63, %v1149_v62  ;;  %v2592_v26 = vsub.f32 %v1091_v12, %v1137_v61  ;;  %v2594_v35 = vsub.f32 %v1093_v13, %v1137_v61  ;;  %v2013_v12 = vld [vmem:[%s2756_s7 + $0x68] sm:$0xff]  }
 0x590   : > { %v2014_v13 = vld [vmem:[%s2756_s7 + $0x28] sm:$0xff]  }
 0x591   : > { %v1138_v42 = vmul.f32 0.00048828125, %v1134_v0  ;;  %1159 = vadd.xlane.f32.xlu1 %v1158_v2  ;;  %v1151_v4 = vmul.f32 %v2592_v26, %v2592_v26  ;;  %v1152_v41 = vmul.f32 %v2594_v35, %v2594_v35  ;;  %1833 = vmatpush3.bf16.msra.mxu0 %v2012_v1 }
 0x592   : > { %1834 = vmatprep.subr.bf16.mxu0 %v2013_v12 }
 0x593   : > { %v1161_v5 = vadd.f32 %v1152_v41, %v1151_v4  ;;  %v2600_v6 = vsub.f32 %v1095_v18, %v1138_v42  ;;  %v2602_v7 = vsub.f32 %v1097_v20, %v1138_v42  ;;  %v2018_v18 = vld [vmem:[%s2756_s7 + $0x18] sm:$0xff]   ;;  %v2019_v20 = vld [vmem:[%s2756_s7 + $0x50] sm:$0xff]  }
 0x595   : > { %1162 = vadd.xlane.f32.xlu0 %v1161_v5  ;;  %v1153_v8 = vmul.f32 %v2600_v6, %v2600_v6  ;;  %v1154_v9 = vmul.f32 %v2602_v7, %v2602_v7  ;;  %1835 = vmatpush3.bf16.msra.mxu0 %v2014_v13 }
 0x596   : > { %1836 = vmatprep.subr.bf16.mxu0 %v2015_v17 }
 0x597   : > { %v1164_v10 = vadd.f32 %v1154_v9, %v1153_v8 }
 0x599   : > { %1165 = vadd.xlane.f32.xlu1 %v1164_v10  ;;  %1837 = vmatpush3.bf16.msra.mxu0 %v2016_v19 }
 0x59a   : > { %1838 = vmatprep.subr.bf16.mxu0 %v2017_v3 }
 0x59d   : > { %1839 = vmatpush3.bf16.msra.mxu0 %v2018_v18 }
 0x59e   : > { %1840 = vmatprep.subr.bf16.mxu0 %v2019_v20 }
 0x5a1   : > { %1841 = vmatpush3.bf16.msra.mxu0 %v2020_v23 }
 0x5a2   : > { %1842 = vmatprep.subr.bf16.mxu0 %v2021_v25 }
 0x5a5   : > { %1843 = vmatpush3.bf16.msra.mxu0 %v2022_v22 }
 0x5a6   : > { %1844 = vmatprep.subr.bf16.mxu0 %v2023_v28 }
 0x5a9   : > { %1845 = vmatpush3.bf16.msra.mxu0 %v2024_v29 }
 0x617   : > { %v1157_v30 = vpop.xlane.xlu0 %1156 }
 0x618   : > { %v1167_v33 = vrot.slane %v1157_v30, 4 }
 0x61a   : > { %v1168_v34 = vadd.f32 %v1167_v33, %v1157_v30  ;;  %v1160_v27 = vpop.xlane.xlu1 %1159 }
 0x61b   : > { %v1173_v38 = vrot.slane %v1160_v27, 4 }
 0x61c   : > { %v1169_v39 = vrot.slane %v1168_v34, 2 }
 0x61d   : > { %v1174_v40 = vadd.f32 %v1173_v38, %v1160_v27 }
 0x61e   : > { %v1170_v31 = vadd.f32 %v1169_v39, %v1168_v34  ;;  %v1163_v32 = vpop.xlane.xlu0 %1162 }
 0x61f   : > { %v1175_v43 = vrot.slane %v1174_v40, 2  ;;  %v1179_v44 = vrot.slane %v1163_v32, 4 }
 0x620   : > { %v1171_v36 = vrot.slane %v1170_v31, 1 }
 0x621   : > { %v1176_v37 = vadd.f32 %v1175_v43, %v1174_v40  ;;  %v1180_v45 = vadd.f32 %v1179_v44, %v1163_v32 }
 0x622   : > { %v1172_v46 = vadd.f32 %v1171_v36, %v1170_v31  ;;  %v1166_v47 = vpop.xlane.xlu1 %1165 }
 0x623   : > { %v1177_v48 = vrot.slane %v1176_v37, 1  ;;  %v1181_v49 = vrot.slane %v1180_v45, 2  ;;  %v1185_v50 = vrot.slane %v1166_v47, 4 }
 0x624   : > { %v1191_v53 = vmul.f32 0.00048828125, %v1172_v46 }
 0x625   : > { %v1178_v54 = vadd.f32 %v1177_v48, %v1176_v37  ;;  %v1182_v55 = vadd.f32 %v1181_v49, %v1180_v45  ;;  %v1186_v56 = vadd.f32 %v1185_v50, %v1166_v47 }
 0x626   : > { %v1195_v57 = vadd.f32 1e-05, %v1191_v53 }
 0x627   : > { %v1192_v59 = vmul.f32 0.00048828125, %v1178_v54  ;;  %v1183_v60 = vrot.slane %v1182_v55, 1  ;;  %v1187_v21 = vrot.slane %v1186_v56, 2 }
 0x628   : > { %2045 = vrsqrt.f32 %v1195_v57 }
 0x629   : > { %v1196_v61 = vadd.f32 1e-05, %v1192_v59  ;;  %v1184_v24 = vadd.f32 %v1183_v60, %v1182_v55  ;;  %v1188_v62 = vadd.f32 %v1187_v21, %v1186_v56 }
 0x62b   : > { %2047 = vrsqrt.f32 %v1196_v61  ;;  %v1193_v63 = vmul.f32 0.00048828125, %v1184_v24  ;;  %v1189_v0 = vrot.slane %v1188_v62, 1 }
 0x62d   : > { %v1197_v2 = vadd.f32 1e-05, %v1193_v63  ;;  %v1190_v42 = vadd.f32 %v1189_v0, %v1188_v62 }
 0x62f   : > { %2049 = vrsqrt.f32 %v1197_v2  ;;  %v1194_v4 = vmul.f32 0.00048828125, %v1190_v42 }
 0x631   : > { %v1198_v41 = vadd.f32 1e-05, %v1194_v4 }
 0x633   : > { %2051 = vrsqrt.f32 %v1198_v41 }
 0x635   : > { %v2046_v5 = vpop.eup %2045 }
 0x636   : > { %v1204_v8 = vmul.f32 %v2046_v5, %v2578_v52  ;;  %v1203_v9 = vmul.f32 %v2046_v5, %v2576_v51 }
 0x638   : > { %v2048_v10 = vpop.eup %2047  ;;  %v1212_v58 = vmax.f32 %v1204_v8, 0.0  ;;  %v1211_v12 = vmax.f32 %v1203_v9, 0.0 }
 0x639   : > { %v1206_v11 = vmul.f32 %v2048_v10, %v2586_v15  ;;  %v1205_v14 = vmul.f32 %v2048_v10, %v2584_v16 }
 0x63b   : > { %v1214_v1 = vmax.f32 %v1206_v11, 0.0  ;;  %v1213_v13 = vmax.f32 %v1205_v14, 0.0 }
 0x63c   : > { %v2050_v17 = vpop.eup %2049 }
 0x63d   : > { %v1220_v19 = vpack.c.bf16 %v1214_v1, %v1212_v58  ;;  %v1219_v3 = vpack.c.bf16 %v1213_v13, %v1211_v12  ;;  %v1208_v18 = vmul.f32 %v2050_v17, %v2594_v35  ;;  %v1207_v20 = vmul.f32 %v2050_v17, %v2592_v26  ;;  %v1781_v26 = vld [vmem:[%s2757_s8] ss:$0 sm:$0xff] }
 0x63f   : > { %1390 = vmatprep.mubr.bf16.mxu0 %v1220_v19  ;;  %v1216_v23 = vmax.f32 %v1208_v18, 0.0  ;;  %v1215_v25 = vmax.f32 %v1207_v20, 0.0 }
 0x640   : > { %v2052_v52 = vpop.eup %2051  ;;  %1391 = vmatmul.mubr.bf16.vlgmr.msra.gmra.mxu0 %v1219_v3 }
 0x641   : > { %v1210_v51 = vmul.f32 %v2052_v52, %v2602_v7  ;;  %v1209_v15 = vmul.f32 %v2052_v52, %v2600_v6 }
 0x643   : > { %v1218_v16 = vmax.f32 %v1210_v51, 0.0  ;;  %v1217_v22 = vmax.f32 %v1209_v15, 0.0 }
 0x645   : > { %v1222_v28 = vpack.c.bf16 %v1218_v16, %v1216_v23  ;;  %v1221_v29 = vpack.c.bf16 %v1217_v22, %v1215_v25 }
 0x647   : > { %1398 = vmatprep.mubr.bf16.mxu0 %v1222_v28 }
 0x648   : > { %1399 = vmatmul.mubr.bf16.gmra.mxu0 %v1221_v29 }
 0x700   : > { %v1846_v30 = vpop.f32.mrf.mxu0 }
 0x702   : > { %v1847_v33 = vpop.f32.mrf.mxu0 }
 0x703   : > { %v1848_v35 = vadd.f32 %v1847_v33, %v1846_v30  ;;  %v2025_v33 = vld [vmem:[#allocation5 + $0x18] sm:$0xff]  }
 0x704   : > { %v1849_v34 = vpop.f32.mrf.mxu0  ;;  %1864 = vmatprep.subr.bf16.mxu0 %v2025_v33 }
 0x705   : > { %v1393_v27 = vadd.f32 %v1848_v35, %v1781_v26  ;;  %1865 = vmatpush3.bf16.msra.mxu0 %v2025_v33  ;;  %v2027_v35 = vld [vmem:[#allocation5 + $0x8] sm:$0xff]  }
 0x706   : > { %v1850_v7 = vpop.f32.mrf.mxu0 }
 0x707   : > { %v1851_v38 = vadd.f32 %v1850_v7, %v1849_v34  ;;  %v1407_v6 = vsel %vm492_vm0, %v1393_v27, 0.0  ;;  %v2028_v34 = vld [vmem:[#allocation5] sm:$0xff]  }
 0x708   : > { %1408 = vadd.xlane.f32.xlu0 %v1407_v6  ;;  %v1852_v39 = vpop.f32.mrf.mxu0 }
 0x709   : > { %v1396_v40 = vadd.f32 %v1851_v38, %v1781_v26 }
 0x70a   : > { %v1853_v31 = vpop.f32.mrf.mxu0 }
 0x70b   : > { %v1854_v32 = vadd.f32 %v1853_v31, %v1852_v39  ;;  %v1410_v43 = vsel %vm492_vm0, %v1396_v40, 0.0 }
 0x70c   : > { %1411 = vadd.xlane.f32.xlu1 %v1410_v43  ;;  %v1855_v44 = vpop.f32.mrf.mxu0 }
 0x70d   : > { %v1401_v36 = vadd.f32 %v1854_v32, %v1781_v26 }
 0x70e   : > { %v1856_v37 = vpop.f32.mrf.mxu0 }
 0x70f   : > { %v1857_v45 = vadd.f32 %v1856_v37, %v1855_v44  ;;  %v1413_v46 = vsel %vm492_vm0, %v1401_v36, 0.0 }
 0x710   : > { %1414 = vadd.xlane.f32.xlu0 %v1413_v46 }
 0x711   : > { %v1404_v47 = vadd.f32 %v1857_v45, %v1781_v26  ;;  %v2026_v26 = vld [vmem:[#allocation5 + $0x10] sm:$0xff]  }
 0x712   : > { %1866 = vmatprep.subr.bf16.mxu0 %v2026_v26 }
 0x713   : > { %v1416_v48 = vsel %vm492_vm0, %v1404_v47, 0.0  ;;  %1867 = vmatpush3.bf16.msra.mxu0 %v2026_v26 }
 0x714   : > { %1417 = vadd.xlane.f32.xlu1 %v1416_v48  ;;  %1868 = vmatprep.subr.bf16.mxu0 %v2027_v35 }
 0x717   : > { %1869 = vmatpush3.bf16.msra.mxu0 %v2027_v35 }
 0x718   : > { %1870 = vmatprep.subr.bf16.mxu0 %v2028_v34 }
 0x71b   : > { %1871 = vmatpush3.bf16.msra.mxu0 %v2028_v34 }
 0x791   : > { %v1409_v49 = vpop.xlane.xlu0 %1408 }
 0x792   : > { %v1419_v50 = vrot.slane %v1409_v49, 4 }
 0x794   : > { %v1420_v53 = vadd.f32 %v1419_v50, %v1409_v49 }
 0x795   : > { %v1412_v54 = vpop.xlane.xlu1 %1411 }
 0x796   : > { %v1421_v55 = vrot.slane %v1420_v53, 2  ;;  %v1425_v56 = vrot.slane %v1412_v54, 4 }
 0x798   : > { %v1422_v57 = vadd.f32 %v1421_v55, %v1420_v53  ;;  %v1426_v59 = vadd.f32 %v1425_v56, %v1412_v54 }
 0x799   : > { %v1415_v60 = vpop.xlane.xlu0 %1414 }
 0x79a   : > { %v1423_v21 = vrot.slane %v1422_v57, 1  ;;  %v1427_v61 = vrot.slane %v1426_v59, 2  ;;  %v1431_v24 = vrot.slane %v1415_v60, 4 }
 0x79c   : > { %v1424_v62 = vadd.f32 %v1423_v21, %v1422_v57  ;;  %v1428_v63 = vadd.f32 %v1427_v61, %v1426_v59  ;;  %v1432_v0 = vadd.f32 %v1431_v24, %v1415_v60 }
 0x79d   : > { %v1418_v2 = vpop.xlane.xlu1 %1417 }
 0x79e   : > { %v1443_v42 = vmul.f32 0.001953125, %v1424_v62  ;;  %v1429_v4 = vrot.slane %v1428_v63, 1  ;;  %v1433_v41 = vrot.slane %v1432_v0, 2  ;;  %v1437_v5 = vrot.slane %v1418_v2, 4 }
 0x7a0   : > { %v1430_v8 = vadd.f32 %v1429_v4, %v1428_v63  ;;  %v1434_v9 = vadd.f32 %v1433_v41, %v1432_v0  ;;  %v1438_v10 = vadd.f32 %v1437_v5, %v1418_v2  ;;  %v2671_v11 = vsub.f32 %v1393_v27, %v1443_v42 }
 0x7a2   : > { %v1444_v14 = vmul.f32 0.001953125, %v1430_v8  ;;  %v1435_v58 = vrot.slane %v1434_v9, 1  ;;  %v1439_v1 = vrot.slane %v1438_v10, 2  ;;  %v1451_v12 = vmul.f32 %v2671_v11, %v2671_v11 }
 0x7a4   : > { %v1436_v13 = vadd.f32 %v1435_v58, %v1434_v9  ;;  %v1440_v17 = vadd.f32 %v1439_v1, %v1438_v10  ;;  %v1455_v19 = vsel %vm492_vm0, %v1451_v12, 0.0  ;;  %v2676_v3 = vsub.f32 %v1396_v40, %v1444_v14 }
 0x7a5   : > { %1456 = vadd.xlane.f32.xlu0 %v1455_v19 }
 0x7a6   : > { %v1445_v18 = vmul.f32 0.001953125, %v1436_v13  ;;  %v1441_v20 = vrot.slane %v1440_v17, 1  ;;  %v1452_v52 = vmul.f32 %v2676_v3, %v2676_v3 }
 0x7a8   : > { %v1442_v51 = vadd.f32 %v1441_v20, %v1440_v17  ;;  %v1458_v15 = vsel %vm492_vm0, %v1452_v52, 0.0  ;;  %v2681_v23 = vsub.f32 %v1401_v36, %v1445_v18 }
 0x7a9   : > { %1459 = vadd.xlane.f32.xlu1 %v1458_v15 }
 0x7aa   : > { %v1446_v16 = vmul.f32 0.001953125, %v1442_v51  ;;  %v1453_v25 = vmul.f32 %v2681_v23, %v2681_v23 }
 0x7ac   : > { %v1461_v22 = vsel %vm492_vm0, %v1453_v25, 0.0  ;;  %v2686_v28 = vsub.f32 %v1404_v47, %v1446_v16 }
 0x7ad   : > { %1462 = vadd.xlane.f32.xlu0 %v1461_v22 }
 0x7ae   : > { %v1454_v29 = vmul.f32 %v2686_v28, %v2686_v28 }
 0x7b0   : > { %v1464_v30 = vsel %vm492_vm0, %v1454_v29, 0.0 }
 0x7b1   : > { %1465 = vadd.xlane.f32.xlu1 %v1464_v30 }
 0x82e   : > { %v1457_v27 = vpop.xlane.xlu0 %1456 }
 0x82f   : > { %v1467_v7 = vrot.slane %v1457_v27, 4 }
 0x831   : > { %v1468_v38 = vadd.f32 %v1467_v7, %v1457_v27 }
 0x832   : > { %v1460_v6 = vpop.xlane.xlu1 %1459 }
 0x833   : > { %v1469_v39 = vrot.slane %v1468_v38, 2  ;;  %v1473_v40 = vrot.slane %v1460_v6, 4 }
 0x835   : > { %v1470_v31 = vadd.f32 %v1469_v39, %v1468_v38  ;;  %v1474_v32 = vadd.f32 %v1473_v40, %v1460_v6 }
 0x836   : > { %v1463_v43 = vpop.xlane.xlu0 %1462 }
 0x837   : > { %v1471_v44 = vrot.slane %v1470_v31, 1  ;;  %v1475_v36 = vrot.slane %v1474_v32, 2  ;;  %v1479_v37 = vrot.slane %v1463_v43, 4 }
 0x839   : > { %v1472_v45 = vadd.f32 %v1471_v44, %v1470_v31  ;;  %v1476_v46 = vadd.f32 %v1475_v36, %v1474_v32  ;;  %v1480_v47 = vadd.f32 %v1479_v37, %v1463_v43 }
 0x83a   : > { %v1466_v48 = vpop.xlane.xlu1 %1465 }
 0x83b   : > { %v1491_v49 = vmul.f32 0.001953125, %v1472_v45  ;;  %v1477_v50 = vrot.slane %v1476_v46, 1  ;;  %v1481_v53 = vrot.slane %v1480_v47, 2  ;;  %v1485_v54 = vrot.slane %v1466_v48, 4 }
 0x83d   : > { %v1495_v55 = vadd.f32 1e-05, %v1491_v49  ;;  %v1478_v56 = vadd.f32 %v1477_v50, %v1476_v46  ;;  %v1482_v57 = vadd.f32 %v1481_v53, %v1480_v47  ;;  %v1486_v59 = vadd.f32 %v1485_v54, %v1466_v48 }
 0x83f   : > { %2053 = vrsqrt.f32 %v1495_v55  ;;  %v1492_v60 = vmul.f32 0.001953125, %v1478_v56  ;;  %v1483_v21 = vrot.slane %v1482_v57, 1  ;;  %v1487_v61 = vrot.slane %v1486_v59, 2 }
 0x841   : > { %v1496_v24 = vadd.f32 1e-05, %v1492_v60  ;;  %v1484_v62 = vadd.f32 %v1483_v21, %v1482_v57  ;;  %v1488_v63 = vadd.f32 %v1487_v61, %v1486_v59 }
 0x843   : > { %2055 = vrsqrt.f32 %v1496_v24  ;;  %v1493_v0 = vmul.f32 0.001953125, %v1484_v62  ;;  %v1489_v2 = vrot.slane %v1488_v63, 1 }
 0x845   : > { %v1497_v42 = vadd.f32 1e-05, %v1493_v0  ;;  %v1490_v4 = vadd.f32 %v1489_v2, %v1488_v63 }
 0x847   : > { %2057 = vrsqrt.f32 %v1497_v42  ;;  %v1494_v41 = vmul.f32 0.001953125, %v1490_v4 }
 0x849   : > { %v1498_v5 = vadd.f32 1e-05, %v1494_v41 }
 0x84b   : > { %2059 = vrsqrt.f32 %v1498_v5 }
 0x84c   : > { %v2054_v8 = vpop.eup %2053 }
 0x84d   : > { %v1503_v9 = vmul.f32 %v2054_v8, %v2671_v11 }
 0x84f   : > { %v1507_v58 = vmax.f32 %v1503_v9, 0.0 }
 0x850   : > { %v2056_v10 = vpop.eup %2055 }
 0x851   : > { %v1504_v14 = vmul.f32 %v2056_v10, %v2676_v3  ;;  %v1798_v3 = vld [vmem:[%s2759_s10] ss:$0 sm:$0xff] }
 0x853   : > { %v1508_v1 = vmax.f32 %v1504_v14, 0.0 }
 0x854   : > { %v2058_v12 = vpop.eup %2057 }
 0x855   : > { %v1511_v13 = vpack.c.bf16 %v1508_v1, %v1507_v58  ;;  %v1505_v17 = vmul.f32 %v2058_v12, %v2681_v23 }
 0x857   : > { %1872 = vmatprep.mubr.msk.bf16.mxu0 %vm492_vm0, %v1511_v13  ;;  %v1509_v20 = vmax.f32 %v1505_v17, 0.0 }
 0x858   : > { %v2060_v19 = vpop.eup %2059 }
 0x859   : > { %v1506_v18 = vmul.f32 %v2060_v19, %v2686_v28 }
 0x85b   : > { %v1510_v52 = vmax.f32 %v1506_v18, 0.0 }
 0x85d   : > { %v1512_v51 = vpack.c.bf16 %v1510_v52, %v1509_v20 }
 0x85f   : > { %1873 = vmatmul.mubr.msk.bf16.vlgmr.msra.gmra.mxu0 %vm492_vm0, %v1512_v51 }
 0x91f   : > { %v1874_v11 = vpop.f32.mrf.mxu0 }
 0x920   : > { %v1601_v25 = vadd.f32 %v1874_v11, %v1798_v3 }
 0x921   : > { %v1592_v15 = vpop.f32.mrf.mxu0 }
 0x922   : > { %v1593_v28 = vadd.f32 %v1798_v3, %v1592_v15 }
 0x923   : > { %v1875_v16 = vpop.f32.mrf.mxu0 }
 0x924   : > { %v1604_v23 = vadd.f32 %v1875_v16, %v1798_v3 }
 0x925   : > { %v1595_v22 = vpop.f32.mrf.mxu0 }
 0x926   : > { %v1827_v29 = vpack.c.bf16 %v1604_v23, %v1601_v25  ;;  %v1596_v30 = vadd.f32 %v1798_v3, %v1595_v22 }
 0x928   : > { %1829 = vst [vmem:[%s410_s12 + $0x8] sm:$0xff] %v1827_v29   ;;  %v1822_v33 = vpack.c.bf16 %v1596_v30, %v1593_v28 }
 0x92a   : > { %1823 = vst [vmem:[%s410_s12] sm:$0xff] %v1822_v33  }
 0x92b   : > { %2126 = shalt.err (!%p2123_p3)
}
 0x92c   : > { %s2127_s25 = scalar_lea.hbm %s2707_s13, 256  ;;  %s2131_s12 = scalar_lea.hbm %s2760_s11, 512 }
 0x92d   : > { %p2128_p2 = scmp.ne.s32.totalorder %s2707_s13, %s2127_s25  ;;  %p2132_p6 = scmp.lt.s32.totalorder %s2707_s13, %s2760_s11 }
 0x92e   : > { %p2133_p9 = scmp.lt.s32.totalorder %s2131_s12, %s2127_s25 }
 0x92f   : > { %p2129_p4 = pnand %p2128_p2, %p2292_p5 }
 0x930   : > { %p2134_p10 = por %p2133_p9, %p2132_p6 }
 0x931   : > { %p2130_p13 = pneg %p2129_p4 }
 0x933   : > { %p2135_p12 = pnand %p2134_p10, %p2130_p13 }
 0x935   : > { %2138 = shalt.err (!%p2135_p12)
}
 0x936   : > { %s2192_s29 = smov 64   ;;  %s2193_s22 = smov 4  }
 0x937   : > { %1884 = dma.vmem_to_hbm [thread:$0]  (%p2292_p5), %s2702_s19, 256, %s2707_s13, %s2709_s15, %s2192_s29, %s2192_s29, %s2193_s22  }
 0x938 PF: > { %p1901_p7 = scmp.ge.s32.totalorder %s2181_s20, 2  ;;  %s1656_s21 = sand.u32 1, %s2169_s17  }
 0x939   : > { %p2776_p8 = scmp.ne.s32.totalorder %s2769_s28, 0  ;;  %s1657_s24 = scalar_lea.sflag [#allocation4], %s1656_s21 }
 0x93b   : > { %p1894_p11 = pnand %p1901_p7, %p2776_p8 }
 0x93d   : > { %p1895_p0 = pneg %p1894_p11 }
 0x93f   : > { %2164 = dma.done.wait (%p1895_p0), %s1657_s24, 256  }
 0x940   : > { %2166 = vsyncadd (%p1895_p0), %s1657_s24, 4294967040  ;;  %s2777_s20 = sld [smem:[#allocation12_spill]]  ;;  %s2780_s17 = smov %s2173_s18 }
 0x941   : > { %s2778_s30 = sld [smem:[#allocation11_spill]] }
 0x942   : > { %s2779_s19 = sld [smem:[#allocation13_spill]] }
 0x946   : > { %p23_p1 = scmp.ge.s32.totalorder %s2777_s20, 4  }
 0x947   : > { %s2781_s18 = smov %s2778_s30 }
 0x948   :  { %25 = sbr.rel (!%p23_p1) target bundleno = 5 (0x5), region = 108 }
 0x94d   :  { %1662 = vsyncpa [#allocation3], 1 }
 0x94e   :  { %1664 = vsyncpa [#allocation3 + $0x1], 1 }
 0x94f   :  { %1665 = vsyncpa [#allocation6], 1 }
 0x950   :  { %1666 = vsyncpa [#allocation4], 1 }
 0x951   :  { %1668 = vsyncpa [#allocation4 + $0x1], 1 }

</bundles_post_ra>
